<compile_context>
chip_gen: v7x
topology: tpu7x:2x2x1
jax: 0.10.0
libtpu: 0.0.40
codegen_flags: <defaults>
</compile_context>

<pallas_src>
from functools import partial

import jax
import jax.numpy as jnp
from jax.experimental import pallas as pl
from jax.experimental.pallas import tpu as pltpu

NORM_EPS = 1e-5
LANE = 128


def conv_bn_relu_kernel(x_ref, w_ref, sb_ref, o_ref, *,
                        K, stride, TH, Wo, Cin, use_im2col):
    """One (batch, output-row tile, Cout tile) per grid step.

    x_ref  : (1, Hp, Wp, Cin)  spatially pre-padded input (bf16); block index
                               is constant along h/co axes -> VMEM resident.
    w_ref  : (K*K*Cin, TCO)    conv weights (bf16), tap-major rows.
    sb_ref : (2, TCO)          f32: row 0 = BN scale, row 1 = BN bias.
    o_ref  : (1, TH*Wo, TCO)   output row tile in (Ho*Wo, Cout) layout (bf16).
    """
    rows_needed = (TH - 1) * stride + K

    h = pl.program_id(1)
    row0 = pl.multiple_of(h * (TH * stride), TH * stride)

    # Rows of the padded image needed by this output-row tile.
    xt = x_ref[0, pl.ds(row0, rows_needed), :, :]          # (rows, Wp, Cin)

    def tap(kh, kw):                                        # (TH*Wo, Cin)
        t = xt[kh:kh + (TH - 1) * stride + 1:stride,
               kw:kw + (Wo - 1) * stride + 1:stride, :]
        return t.reshape(TH * Wo, Cin)

    taps = [(kh, kw) for kh in range(K) for kw in range(K)]

    if use_im2col:
        # Small Cin: merge all K*K taps into one fat-contraction matmul so the
        # MXU sees a K*K*Cin-deep contraction instead of K*K skinny ones.
        patch = jnp.concatenate([tap(kh, kw) for kh, kw in taps], axis=-1)
        acc = jnp.dot(patch, w_ref[...], preferred_element_type=jnp.float32)
    else:
        # Large Cin: per-tap matmuls accumulated in f32 (no 9x im2col VMEM;
        # Cin already fills the MXU depth, MRB makes the accumulation cheap
        # on v7x).
        acc = None
        for idx, (kh, kw) in enumerate(taps):
            part = jnp.dot(tap(kh, kw),
                           w_ref[idx * Cin:(idx + 1) * Cin, :],
                           preferred_element_type=jnp.float32)
            acc = part if acc is None else acc + part

    # BatchNorm (eval mode, folded to per-channel scale/bias in f32) + ReLU.
    scale = sb_ref[0:1, :]
    bias = sb_ref[1:2, :]
    y = jnp.maximum(acc * scale + bias, 0.0)
    o_ref[0] = y.astype(o_ref.dtype)


def _round_up(x, m):
    return -(-x // m) * m


def conv_bn_relu(x_nchw, weight_oihw, gamma, beta, running_mean, running_var,
                 *, stride=1, padding=1):
    N, Cin, H, W = x_nchw.shape
    Cout, Cin_w, K, K2 = weight_oihw.shape
    assert Cin_w == Cin and K == K2, "groups > 1 not supported"

    Ho = (H + 2 * padding - K) // stride + 1
    Wo = (W + 2 * padding - K) // stride + 1
    Hp, Wp = H + 2 * padding, W + 2 * padding

    # ---- BatchNorm (eval) as per-channel scale/bias, applied post-matmul ----
    scale = (gamma.astype(jnp.float32)
             / jnp.sqrt(running_var.astype(jnp.float32) + NORM_EPS))
    bias = beta.astype(jnp.float32) - running_mean.astype(jnp.float32) * scale

    # ---- Cout padding: lane-dense only when it pays for itself --------------
    if Cout >= LANE:
        Cout_p = _round_up(Cout, LANE)
    else:
        Cout_p = _round_up(max(Cout, 1), 8)

    # OIHW -> HWIO -> (K*K*Cin, Cout_p), bf16, tap-major rows.
    w = jnp.transpose(weight_oihw.astype(jnp.float32), (2, 3, 1, 0))
    w = w.reshape(K * K * Cin, Cout)
    w = jnp.pad(w, ((0, 0), (0, Cout_p - Cout))).astype(jnp.bfloat16)
    sb = jnp.stack([jnp.pad(scale, (0, Cout_p - Cout)),
                    jnp.pad(bias, (0, Cout_p - Cout))], axis=0)  # (2, Cout_p) f32

    # ---- Input: NCHW -> NHWC, bf16, pad spatially ----------------------------
    x = jnp.transpose(x_nchw, (0, 2, 3, 1)).astype(jnp.bfloat16)
    x_pad = jnp.pad(x, ((0, 0), (padding, padding), (padding, padding), (0, 0)))

    # ---- Generation-aware sizing ---------------------------------------------
    try:
        vmem_cap = int(pltpu.get_tpu_info().vmem_capacity_bytes)
    except Exception:
        vmem_cap = 64 << 20            # conservative (v7x-sized) fallback
    vmem_budget = int(vmem_cap * 0.85)

    is_v5e = False
    try:
        kind = jax.devices()[0].device_kind.lower()
        is_v5e = ("v5 lite" in kind) or ("v5e" in kind) or ("v5lite" in kind)
    except Exception:
        pass

    if Cout_p < LANE:
        TCO = Cout_p
    elif (not is_v5e) and (Cout_p % 256 == 0):
        TCO = 256                       # fills the 2x256^2 MXU on v6e/v7x
    else:
        TCO = 128                       # v5e MXU is 128-wide; no gain from 256
    n_co = Cout_p // TCO

    use_im2col = Cin < 128              # fat contraction only for small Cin

    # ---- Spatial (output-row) tile: largest divisor of Ho fitting VMEM ------
    fixed_bytes = (2 * Hp * Wp * Cin * 2            # resident input blocks (bf16)
                   + 2 * K * K * Cin * TCO * 2      # weight blocks (bf16)
                   + 2 * 2 * TCO * 4)               # scale/bias blocks (f32)

    def per_tile_bytes(th):
        rows_needed = (th - 1) * stride + K
        patch = th * Wo * (K * K * Cin if use_im2col else 2 * Cin) * 2
        return (rows_needed * Wp * Cin * 2          # sliced input rows
                + patch                             # im2col patch / tap slices
                + th * Wo * TCO * 4                 # f32 accumulator
                + 2 * th * Wo * TCO * 2)            # output blocks (bf16)

    tile_budget = max(vmem_budget - fixed_bytes, 2 << 20)
    valid_ths = [th for th in range(1, Ho + 1)
                 if Ho % th == 0 and (th == Ho or (th * Wo) % 8 == 0)]
    TH = valid_ths[0]
    for th in valid_ths:
        if 2 * per_tile_bytes(th) <= tile_budget:   # 2x headroom for temporaries
            TH = th
    n_h = Ho // TH

    need = fixed_bytes + 2 * per_tile_bytes(TH) + (4 << 20)
    vmem_limit = int(min(max(need, 32 << 20), vmem_budget))

    kernel = partial(conv_bn_relu_kernel, K=K, stride=stride, TH=TH, Wo=Wo,
                     Cin=Cin, use_im2col=use_im2col)

    out = pl.pallas_call(
        kernel,
        out_shape=jax.ShapeDtypeStruct((N, Ho * Wo, Cout_p), jnp.bfloat16),
        grid_spec=pltpu.PrefetchScalarGridSpec(
            num_scalar_prefetch=0,
            grid=(N, n_h, n_co),                    # co innermost: x & weights resident
            in_specs=[
                # Full padded image per batch element; constant along h/co.
                pl.BlockSpec((1, Hp, Wp, Cin), lambda n, h, co: (n, 0, 0, 0)),
                pl.BlockSpec((K * K * Cin, TCO), lambda n, h, co: (0, co)),
                pl.BlockSpec((2, TCO), lambda n, h, co: (0, co)),
            ],
            out_specs=pl.BlockSpec((1, TH * Wo, TCO),
                                   lambda n, h, co: (n, h, co)),
        ),
        compiler_params=pltpu.CompilerParams(
            dimension_semantics=("parallel", "parallel", "parallel"),
            vmem_limit_bytes=vmem_limit),
    )(x_pad, w, sb)

    # Drop Cout padding, back to NCHW f32 to match the PyTorch interface.
    out = out[:, :, :Cout].reshape(N, Ho, Wo, Cout)
    return jnp.transpose(out, (0, 3, 1, 2)).astype(jnp.float32)


def reference(x_nchw, weight_oihw, gamma, beta, running_mean, running_var,
              *, stride=1, padding=1):
    y = jax.lax.conv_general_dilated(
        x_nchw.astype(jnp.float32), weight_oihw.astype(jnp.float32),
        window_strides=(stride, stride),
        padding=[(padding, padding), (padding, padding)],
        dimension_numbers=("NCHW", "OIHW", "NCHW"))
    scale = gamma / jnp.sqrt(running_var + NORM_EPS)
    bias = beta - running_mean * scale
    y = y * scale[None, :, None, None] + bias[None, :, None, None]
    return jnp.maximum(y, 0.0)


if __name__ == "__main__":
    key = jax.random.PRNGKey(0)
    k_x, k_w, k_g, k_b, k_m, k_v = jax.random.split(key, 6)

    N, Cin, H, W = 2, 4, 16, 16
    Cout, K, stride = 8, 3, 1

    x = jax.random.normal(k_x, (N, Cin, H, W), jnp.float32)
    weight = jax.random.normal(k_w, (Cout, Cin, K, K), jnp.float32) * 0.1
    gamma = jax.random.normal(k_g, (Cout,), jnp.float32) * 0.1 + 1.0
    beta = jax.random.normal(k_b, (Cout,), jnp.float32) * 0.1
    running_mean = jax.random.normal(k_m, (Cout,), jnp.float32) * 0.1
    running_var = jax.random.uniform(k_v, (Cout,), jnp.float32,
                                     minval=0.5, maxval=1.5)

    out = conv_bn_relu(x, weight, gamma, beta, running_mean, running_var,
                       stride=stride, padding=1)
    out = jax.block_until_ready(out)

    ref = reference(x, weight, gamma, beta, running_mean, running_var,
                    stride=stride, padding=1)
    assert out.shape == (N, Cout, H, W), out.shape
    # bf16 inputs / f32 accumulation -> looser tolerance than pure f32.
    assert jnp.allclose(out, ref, atol=3e-2, rtol=3e-2), \
        float(jnp.max(jnp.abs(out - ref)))

    print("KERNEL_OK")
</pallas_src>

<mosaic_0001>
module attributes {stable_mosaic.version = 11 : i64} {
  func.func @conv_bn_relu_kernel(%arg0: i32, %arg1: i32, %arg2: i32, %arg3: memref<1x18x18x4xbf16, #tpu.memory_space<vmem>>, %arg4: memref<36x8xbf16, #tpu.memory_space<vmem>>, %arg5: memref<2x8xf32, #tpu.memory_space<vmem>>, %arg6: memref<1x256x8xbf16, #tpu.memory_space<vmem>>) attributes {dimension_semantics = [#tpu.dimension_semantics<parallel>, #tpu.dimension_semantics<parallel>, #tpu.dimension_semantics<parallel>], iteration_bounds = array<i64: 2, 1, 1>, scalar_prefetch = 0 : i64, scratch_operands = 0 : i64, tpu.core_type = #tpu.core_type<tc>, window_params = [{transform_indices = @transform_0, window_bounds = array<i64: 1, 18, 18, 4>}, {transform_indices = @transform_1, window_bounds = array<i64: 36, 8>}, {transform_indices = @transform_2, window_bounds = array<i64: 2, 8>}, {transform_indices = @transform_3, window_bounds = array<i64: 1, 256, 8>}]} {
    %c16_i32 = arith.constant 16 : i32
    %0 = arith.muli %arg1, %c16_i32 : i32
    %1 = tpu.assume_multiple %0, 16 : i32
    %c0 = arith.constant 0 : index
    %2 = arith.index_cast %1 : i32 to index
    %c0_0 = arith.constant 0 : index
    %c0_1 = arith.constant 0 : index
    %3 = vector.load %arg3[%c0, %2, %c0_0, %c0_1] : memref<1x18x18x4xbf16, #tpu.memory_space<vmem>>, vector<1x18x18x4xbf16>
    %4 = vector.shape_cast %3 : vector<1x18x18x4xbf16> to vector<18x18x4xbf16>
    %5 = vector.extract_strided_slice %4 {offsets = [0, 0, 0], sizes = [16, 16, 4], strides = [1, 1, 1]} : vector<18x18x4xbf16> to vector<16x16x4xbf16>
    %6 = vector.shape_cast %5 : vector<16x16x4xbf16> to vector<256x4xbf16>
    %7 = vector.extract_strided_slice %4 {offsets = [0, 1, 0], sizes = [16, 16, 4], strides = [1, 1, 1]} : vector<18x18x4xbf16> to vector<16x16x4xbf16>
    %8 = vector.shape_cast %7 : vector<16x16x4xbf16> to vector<256x4xbf16>
    %9 = vector.extract_strided_slice %4 {offsets = [0, 2, 0], sizes = [16, 16, 4], strides = [1, 1, 1]} : vector<18x18x4xbf16> to vector<16x16x4xbf16>
    %10 = vector.shape_cast %9 : vector<16x16x4xbf16> to vector<256x4xbf16>
    %11 = vector.extract_strided_slice %4 {offsets = [1, 0, 0], sizes = [16, 16, 4], strides = [1, 1, 1]} : vector<18x18x4xbf16> to vector<16x16x4xbf16>
    %12 = vector.shape_cast %11 : vector<16x16x4xbf16> to vector<256x4xbf16>
    %13 = vector.extract_strided_slice %4 {offsets = [1, 1, 0], sizes = [16, 16, 4], strides = [1, 1, 1]} : vector<18x18x4xbf16> to vector<16x16x4xbf16>
    %14 = vector.shape_cast %13 : vector<16x16x4xbf16> to vector<256x4xbf16>
    %15 = vector.extract_strided_slice %4 {offsets = [1, 2, 0], sizes = [16, 16, 4], strides = [1, 1, 1]} : vector<18x18x4xbf16> to vector<16x16x4xbf16>
    %16 = vector.shape_cast %15 : vector<16x16x4xbf16> to vector<256x4xbf16>
    %17 = vector.extract_strided_slice %4 {offsets = [2, 0, 0], sizes = [16, 16, 4], strides = [1, 1, 1]} : vector<18x18x4xbf16> to vector<16x16x4xbf16>
    %18 = vector.shape_cast %17 : vector<16x16x4xbf16> to vector<256x4xbf16>
    %19 = vector.extract_strided_slice %4 {offsets = [2, 1, 0], sizes = [16, 16, 4], strides = [1, 1, 1]} : vector<18x18x4xbf16> to vector<16x16x4xbf16>
    %20 = vector.shape_cast %19 : vector<16x16x4xbf16> to vector<256x4xbf16>
    %21 = vector.extract_strided_slice %4 {offsets = [2, 2, 0], sizes = [16, 16, 4], strides = [1, 1, 1]} : vector<18x18x4xbf16> to vector<16x16x4xbf16>
    %22 = vector.shape_cast %21 : vector<16x16x4xbf16> to vector<256x4xbf16>
    %23 = tpu.concatenate %6, %8, %10, %12, %14, %16, %18, %20, %22 in 1 : vector<256x4xbf16>, vector<256x4xbf16>, vector<256x4xbf16>, vector<256x4xbf16>, vector<256x4xbf16>, vector<256x4xbf16>, vector<256x4xbf16>, vector<256x4xbf16>, vector<256x4xbf16> -> vector<256x36xbf16>
    %c0_2 = arith.constant 0 : index
    %c0_3 = arith.constant 0 : index
    %24 = vector.load %arg4[%c0_2, %c0_3] : memref<36x8xbf16, #tpu.memory_space<vmem>>, vector<36x8xbf16>
    %cst = arith.constant dense<0.000000e+00> : vector<256x8xf32>
    %25 = tpu.matmul %23, %24, %cst {dimension_numbers = #tpu.dot_dimension_numbers<[1], [0], [0], [1], [0, 0, 1, 1], [], []>} : vector<256x36xbf16>, vector<36x8xbf16>, vector<256x8xf32> -> vector<256x8xf32>
    %c0_4 = arith.constant 0 : index
    %c0_5 = arith.constant 0 : index
    %26 = vector.load %arg5[%c0_4, %c0_5] : memref<2x8xf32, #tpu.memory_space<vmem>>, vector<1x8xf32>
    %c1 = arith.constant 1 : index
    %c0_6 = arith.constant 0 : index
    %27 = vector.load %arg5[%c1, %c0_6] : memref<2x8xf32, #tpu.memory_space<vmem>>, vector<1x8xf32>
    %28 = vector.broadcast %26 : vector<1x8xf32> to vector<256x8xf32>
    %29 = arith.mulf %25, %28 : vector<256x8xf32>
    %30 = vector.broadcast %27 : vector<1x8xf32> to vector<256x8xf32>
    %31 = arith.addf %29, %30 : vector<256x8xf32>
    %cst_7 = arith.constant 0.000000e+00 : f32
    %32 = vector.broadcast %cst_7 : f32 to vector<256x8xf32>
    %33 = arith.maximumf %31, %32 : vector<256x8xf32>
    %34 = arith.truncf %33 : vector<256x8xf32> to vector<256x8xbf16>
    %c0_8 = arith.constant 0 : index
    %c0_9 = arith.constant 0 : index
    %c0_10 = arith.constant 0 : index
    %35 = vector.load %arg6[%c0_8, %c0_9, %c0_10] : memref<1x256x8xbf16, #tpu.memory_space<vmem>>, vector<1x256x8xbf16>
    %36 = vector.shape_cast %35 : vector<1x256x8xbf16> to vector<256x8xbf16>
    %37 = vector.shape_cast %34 : vector<256x8xbf16> to vector<1x256x8xbf16>
    tpu.vector_store %arg6[%c0_8, %c0_9, %c0_10], %37 {strides = array<i32>} : memref<1x256x8xbf16, #tpu.memory_space<vmem>>, vector<1x256x8xbf16>,
    return
  }
  func.func @transform_0(%arg0: i32, %arg1: i32, %arg2: i32) -> (i32, i32, i32, i32) {
    %c0_i32 = arith.constant 0 : i32
    %c0_i32_0 = arith.constant 0 : i32
    %c0_i32_1 = arith.constant 0 : i32
    %c0_i32_2 = arith.constant 0 : i32
    return %arg0, %c0_i32, %c0_i32_0, %c0_i32_1 : i32, i32, i32, i32
  }
  func.func @transform_1(%arg0: i32, %arg1: i32, %arg2: i32) -> (i32, i32) {
    %c0_i32 = arith.constant 0 : i32
    %c0_i32_0 = arith.constant 0 : i32
    return %c0_i32, %arg2 : i32, i32
  }
  func.func @transform_2(%arg0: i32, %arg1: i32, %arg2: i32) -> (i32, i32) {
    %c0_i32 = arith.constant 0 : i32
    %c0_i32_0 = arith.constant 0 : i32
    return %c0_i32, %arg2 : i32, i32
  }
  func.func @transform_3(%arg0: i32, %arg1: i32, %arg2: i32) -> (i32, i32, i32) {
    %c0_i32 = arith.constant 0 : i32
    return %arg0, %arg1, %arg2 : i32, i32, i32
  }
}

</mosaic_0001>

<bundles_post_ra>
// kernel: tpu_custom_call.1
= control target key start
LH: loop header
LB: loop body
LE: loop exit
PB: predicated region body
PF: predicated region fallthrough
CT: control target
= control target key end

     0   :  { %s2570_s12 = smov 0   ;;  %s2572_s13 = smov 0   ;;  %s3843_s0 = inlined_call_operand.vmem [shape: bf16[2,18,18,4], index: 0, kind: input, shape index: {}]   ;;  %s3844_s1 = inlined_call_operand.vmem [shape: bf16[36,8], index: 1, kind: input, shape index: {}]   ;;  %s3845_s2 = inlined_call_operand.vmem [shape: f32[2,8], index: 2, kind: input, shape index: {}]   ;;  %s3846_s3 = inlined_call_operand.vmem [shape: bf16[2,256,8], index: 3, kind: output, shape index: {}]  }
   0x1   :  { %s2574_s14 = smov 0  }
   0x2 LB: > { %s32_s15 = sadd.s32 1, %s2536_s13  ;;  %p2235_p0 = scmp.ge.s32.totalorder %s2540_s14, 1  ;;  %s2540_s14 = sphi %s2574_s14, %s13_s14   ;;  %s2536_s13 = sphi %s2572_s13, %s3873_s13   ;;  %s2532_s12 = sphi %s2570_s12, %s3872_s12  }
   0x3   : > { %p34_p1 = scmp.ge.s32.totalorder %s32_s15, 2  ;;  %p178_p2 = scmp.lt.s32.totalorder %s2540_s14, 3 }
   0x5   : > { %s3875_s15 = smov (%p34_p1, %s32_s15), 0  ;;  %p179_p3 = pnand %p2235_p0, %p178_p2 }
   0x7   : > { %182 = sbr.rel (%p179_p3) target bundleno = 630 (0x276), region = 32 }
   0xe   : > { %p217_p4 = scmp.lt.s32.totalorder %s2532_s12, 1  ;;  %vm737_vm0 = vcmask 1042432   ;;  %vm738_vm1 = vcmask 1046532   ;;  %vm302_vm2 = vsmask.f32 3328  ;;  %s2542_s20 = smov 12  }
   0xf   : > { %vm303_vm3 = vsmask.f32 7440  ;;  %vm2626_vm4 = vmor %vm737_vm0, %vm738_vm1  ;;  %s2543_s21 = smov 8   ;;  %s2544_s22 = smov 4   ;;  %vm1671_vm6 = vcmask 1041408   ;;  %vm1338_vm7 = vcmask 31744  }
  0x10   : > { %s3877_s12 = smov (!%p217_p4, %s2532_s12), 1  ;;  %vm2671_vm5 = vmor %vm302_vm2, %vm303_vm3  ;;  %s2545_s23 = smov 16   ;;  %vm1387_vm8 = vcmask 64512   ;;  %vm1420_vm9 = vcmask 97280   ;;  %vm1453_vm10 = vcmask 130048   ;;  %vm1486_vm11 = vcmask 162816  }
  0x11   : > { %s2464_s16 = smul.u32 216, %s3877_s12  ;;  %s2546_s24 = smov 20   ;;  %vm1519_vm12 = vcmask 195584   ;;  %vm1552_vm13 = vcmask 228352   ;;  %vm1585_vm14 = vcmask 261120   ;;  %vm1638_vm15 = vcmask 293888  }
  0x12   : > { %s2547_s25 = smov 24   ;;  %s2548_s28 = smov 28   ;;  %vm2070_vm0 = vcmask 60416  }
  0x13   : > { %s2594_s19 = scalar_lea.vmem %s3843_s0, %s2464_s16  ;;  %s2549_s4 = smov 32  }
  0x14   : > { %v2597_v0 = vld [vmem:[%s2594_s19 + $0x6c] sm:$0xf]  ;;  %v2600_v1 = vld [vmem:[%s2594_s19 + $0x70] sm:$0xf]  ;;  %v2614_v12 = vld [vmem:[%s2594_s19 + $0x60] sm:$0xf] }
  0x15   : > { %v251_v2 = vld [vmem:[%s2594_s19 + $0xc] sm:$0xf]  ;;  %v535_v3 = vshrl.u32 %v2600_v1, 16  ;;  %v2606_v4 = vcombine.low %v2597_v0, %v2600_v1  ;;  %v522_v5 = vshrl.u32 %v2597_v0, 16  ;;  %v525_v6 = vshll.u32 %v2597_v0, 16  ;;  %s2366_s11 = sshll.u32 %s3877_s12, 7 }
  0x16   : > { %v252_v7 = vld [vmem:[%s2594_s19 + $0x10] sm:$0xf]  ;;  %v330_v11 = vshrl.u32 %v251_v2, 16  ;;  %v333_v13 = vshll.u32 %v251_v2, 16  ;;  %v2619_v14 = vld [vmem:[%s2594_s19 + $0x64] sm:$0xf]  ;;  %s3711_s18 = scalar_lea.vmem %s3846_s3, %s2366_s11 }
  0x17   : > { %v339_v8 = vshll.u32 %v252_v7, 16  ;;  %v343_v9 = vshrl.u32 %v252_v7, 16  ;;  %v2611_v10 = vcombine.low %v251_v2, %v252_v7  ;;  %1147 = vrot.lane.b32.xlu1 %v2606_v4, %s2542_s20  ;;  %v2622_v15 = vld [vmem:[%s2594_s19 + $0x68] sm:$0x1]  ;;  %v2247_v17 = vrot.slane %v2614_v12, 9 }
  0x18   : > { %v332_v19 = vrot.slane %v330_v11, 4  ;;  %v798_v20 = vrot.slane %v2619_v14, 5  ;;  %v801_v21 = vrot.slane %v2622_v15, 5  ;;  %v2636_v22 = vld [vmem:[%s2594_s19] sm:$0xf]  ;;  %v335_v23 = vrot.slane %v333_v13, 5 }
  0x19   : > { %v345_v18 = vrot.slane %v343_v9, 4  ;;  %1131 = vrot.lane.b32.xlu0 %v2611_v10, %s2542_s20  ;;  %v2639_v24 = vld [vmem:[%s2594_s19 + $0x4] sm:$0xf]  ;;  %v250_v25 = vld [vmem:[%s2594_s19 + $0x8] sm:$0x1]  ;;  %v2239_v26 = vrot.slane %v2636_v22, 9 }
  0x1a   : > { %v799_v27 = vsel %vm2626_vm4, %v2247_v17, %v798_v20  ;;  %v800_v28 = vrot.slane %v798_v20, 4  ;;  %v742_v29 = vrot.slane %v2639_v24, 5  ;;  %v745_v30 = vrot.slane %v250_v25, 5  ;;  %v2647_v31 = vld [vmem:[%s2594_s19 + $0x74] sm:$0x1] }
  0x1b   : > { %v2248_v32 = vrot.slane %v2597_v0, 9  ;;  %v805_v33 = vrot.slane %v2600_v1, 5  ;;  %v808_v34 = vrot.slane %v2647_v31, 5  ;;  %v253_v35 = vld [vmem:[%s2594_s19 + $0x14] sm:$0x1]  ;;  %v2240_v36 = vrot.slane %v251_v2, 9 }
  0x1c   : > { %v802_v37 = vsel %vm2626_vm4, %v800_v28, %v801_v21  ;;  %v743_v38 = vsel %vm2626_vm4, %v2239_v26, %v742_v29  ;;  %v744_v39 = vrot.slane %v742_v29, 4  ;;  %v749_v40 = vrot.slane %v252_v7, 5 }
  0x1d   : > { %v2657_v41 = vcombine.low %v799_v27, %v802_v37  ;;  %v806_v42 = vsel %vm2626_vm4, %v2248_v32, %v805_v33  ;;  %v807_v43 = vrot.slane %v805_v33, 4  ;;  %v752_v44 = vrot.slane %v253_v35, 5 }
  0x1e   : > { %v746_v45 = vsel %vm2626_vm4, %v744_v39, %v745_v30  ;;  %v750_v46 = vsel %vm2626_vm4, %v2240_v36, %v749_v40  ;;  %v751_v47 = vrot.slane %v749_v40, 4  ;;  %v336_v48 = vor.u32 %v335_v23, %v332_v19  ;;  %v2715_v39 = vld [vmem:[%s2594_s19 + $0x7c] sm:$0xf] }
  0x1f   : > { %1112 = vrot.lane.b32.xlu1 %v2657_v41, %s2543_s21  ;;  %v2289_v49 = vcombine.low %v743_v38, %v746_v45  ;;  %v809_v50 = vsel %vm2626_vm4, %v807_v43, %v808_v34  ;;  %v341_v52 = vrot.slane %v339_v8, 5  ;;  %v349_v53 = vshll.u32 %v253_v35, 16  ;;  %v2710_v35 = vld [vmem:[%s2594_s19 + $0x78] sm:$0xf] }
  0x20   : > { %v2675_v54 = vcombine.low %v806_v42, %v809_v50  ;;  %v753_v55 = vsel %vm2626_vm4, %v751_v47, %v752_v44  ;;  %v337_v56 = vrot.slane %v336_v48, 4  ;;  %v306_v57 = vshrl.u32 %v2636_v22, 16  ;;  %v2727_v50 = vld [vmem:[%s2594_s19 + $0x1c] sm:$0xf] }
  0x21   : > { %1096 = vrot.lane.b32.xlu0 %v2289_v49, %s2543_s21  ;;  %v2681_v58 = vcombine.low %v750_v46, %v753_v55  ;;  %v346_v59 = vor.u32 %v345_v18, %v341_v52  ;;  %v351_v60 = vrot.slane %v349_v53, 5  ;;  %v309_v61 = vshll.u32 %v2636_v22, 16  ;;  %v2724_v49 = vld [vmem:[%s2594_s19 + $0x18] sm:$0xf] }
  0x22   : > { %3858 = vst [vmem:[#allocation2_spill] sm:$0xff] %v2675_v54  ;;  %v342_v62 = vsel %vm2671_vm5, %v337_v56, %v341_v52  ;;  %v308_v63 = vrot.slane %v306_v57, 4  ;;  %v315_v2 = vshll.u32 %v2639_v24, 16  ;;  %v319_v7 = vshrl.u32 %v2639_v24, 16 }
  0x23   : > { %1114 = vrot.lane.b32.xlu1 %v2675_v54, %s2543_s21  ;;  %v347_v8 = vrot.slane %v346_v59, 4  ;;  %v311_v9 = vrot.slane %v309_v61, 5  ;;  %v325_v11 = vshll.u32 %v250_v25, 16  ;;  %v524_v13 = vrot.slane %v522_v5, 4 }
  0x24   : > { %v317_v17 = vrot.slane %v315_v2, 5  ;;  %v321_v18 = vrot.slane %v319_v7, 4  ;;  %v527_v19 = vrot.slane %v525_v6, 5  ;;  %v531_v20 = vshll.u32 %v2600_v1, 16 }
  0x25   : > { %1098 = vrot.lane.b32.xlu0 %v2681_v58, %s2543_s21  ;;  %v352_v21 = vsel %vm2671_vm5, %v347_v8, %v351_v60  ;;  %v312_v23 = vor.u32 %v311_v9, %v308_v63  ;;  %v327_v26 = vrot.slane %v325_v11, 5  ;;  %v537_v25 = vrot.slane %v535_v3, 4  ;;  %v280_v60 = vld [vmem:[%s2594_s19 + $0x80] sm:$0x1] }
  0x26   : > { %v2701_v5 = vcombine.low %v342_v62, %v352_v21  ;;  %v322_v27 = vor.u32 %v321_v18, %v317_v17  ;;  %v528_v28 = vor.u32 %v527_v19, %v524_v13  ;;  %v533_v0 = vrot.slane %v531_v20, 5  ;;  %v2751_v20 = vld [vmem:[%s2594_s19 + $0x20] sm:$0x1] }
  0x27   : > { %v313_v6 = vrot.slane %v312_v23, 4  ;;  %v541_v29 = vshll.u32 %v2647_v31, 16  ;;  %v498_v30 = vshrl.u32 %v2614_v12, 16  ;;  %v501_v32 = vshll.u32 %v2614_v12, 16 }
  0x28   : > { %1018 = vrot.lane.b32.xlu1 %v2701_v5, %s2544_s22  ;;  %v323_v1 = vrot.slane %v322_v27, 4  ;;  %v529_v33 = vrot.slane %v528_v28, 4  ;;  %v538_v3 = vor.u32 %v537_v25, %v533_v0  ;;  %v507_v34 = vshll.u32 %v2619_v14, 16 }
  0x29   : > { %v318_v31 = vsel %vm2671_vm5, %v313_v6, %v317_v17  ;;  %v543_v36 = vrot.slane %v541_v29, 5  ;;  %v500_v37 = vrot.slane %v498_v30, 4  ;;  %v503_v38 = vrot.slane %v501_v32, 5 }
  0x2a   : > { %v328_v40 = vsel %vm2671_vm5, %v323_v1, %v327_v26  ;;  %v534_v42 = vsel %vm2671_vm5, %v529_v33, %v533_v0  ;;  %v539_v43 = vrot.slane %v538_v3, 4  ;;  %v509_v44 = vrot.slane %v507_v34, 5 }
  0x2b   : > { %v2273_v45 = vcombine.low %v318_v31, %v328_v40  ;;  %v504_v46 = vor.u32 %v503_v38, %v500_v37  ;;  %v511_v47 = vshrl.u32 %v2619_v14, 16  ;;  %v517_v48 = vshll.u32 %v2622_v15, 16 }
  0x2c   : > { %v544_v52 = vsel %vm2671_vm5, %v539_v43, %v543_v36  ;;  %v546_v53 = vshrl.u32 %v2710_v35, 16  ;;  %v549_v55 = vshll.u32 %v2710_v35, 16  ;;  %v559_v56 = vshrl.u32 %v2715_v39, 16 }
  0x2d   : > { %1016 = vrot.lane.b32.xlu0 %v2273_v45, %s2544_s22  ;;  %v2735_v57 = vcombine.low %v534_v42, %v544_v52  ;;  %v505_v59 = vrot.slane %v504_v46, 4  ;;  %v513_v15 = vrot.slane %v511_v47, 4  ;;  %v519_v61 = vrot.slane %v517_v48, 5  ;;  %v2778_v52 = vld [vmem:[%s2594_s19 + $0x84] sm:$0xf] }
  0x2e   : > { %v354_v62 = vshrl.u32 %v2724_v49, 16  ;;  %v357_v63 = vshll.u32 %v2724_v49, 16  ;;  %v367_v2 = vshrl.u32 %v2727_v50, 16  ;;  %v2747_v9 = vcombine.low %v2710_v35, %v2715_v39 }
  0x2f   : > { %3859 = vst [vmem:[#allocation3_spill] sm:$0xff] %v2735_v57  ;;  %1034 = vrot.lane.b32.xlu1 %v2735_v57, %s2544_s22  ;;  %v510_v7 = vsel %vm2671_vm5, %v505_v59, %v509_v44  ;;  %v514_v8 = vor.u32 %v513_v15, %v509_v44  ;;  %v548_v11 = vrot.slane %v546_v53, 4  ;;  %v551_v13 = vrot.slane %v549_v55, 5  ;;  %v2781_v53 = vld [vmem:[%s2594_s19 + $0x88] sm:$0xf] }
  0x30   : > { %v555_v17 = vshll.u32 %v2715_v39, 16  ;;  %v561_v18 = vrot.slane %v559_v56, 4  ;;  %v565_v19 = vshll.u32 %v280_v60, 16  ;;  %v356_v23 = vrot.slane %v354_v62, 4 }
  0x31   : > { %v515_v21 = vrot.slane %v514_v8, 4  ;;  %v359_v26 = vrot.slane %v357_v63, 5  ;;  %v363_v25 = vshll.u32 %v2727_v50, 16  ;;  %v552_v27 = vor.u32 %v551_v13, %v548_v11  ;;  %v2811_v13 = vld [vmem:[%s2594_s19 + $0x24] sm:$0xf] }
  0x32   : > { %v557_v28 = vrot.slane %v555_v17, 5  ;;  %v369_v0 = vrot.slane %v367_v2, 4  ;;  %v373_v32 = vshll.u32 %v2751_v20, 16  ;;  %v567_v34 = vrot.slane %v565_v19, 5  ;;  %v2814_v17 = vld [vmem:[%s2594_s19 + $0x28] sm:$0xf] }
  0x33   : > { %v520_v6 = vsel %vm2671_vm5, %v515_v21, %v519_v61  ;;  %1149 = vrot.lane.b32.xlu1 %v2747_v9, %s2542_s20  ;;  %v360_v29 = vor.u32 %v359_v26, %v356_v23  ;;  %v365_v30 = vrot.slane %v363_v25, 5  ;;  %v553_v33 = vrot.slane %v552_v27, 4  ;;  %v2817_v23 = vld [vmem:[%s2594_s19 + $0x8c] sm:$0x1] }
  0x34   : > { %v2759_v1 = vcombine.low %v510_v7, %v520_v6  ;;  %v562_v3 = vor.u32 %v561_v18, %v557_v28  ;;  %v812_v36 = vrot.slane %v2715_v39, 5  ;;  %v2766_v37 = vcombine.low %v2724_v49, %v2727_v50 }
  0x35   : > { %v370_v31 = vor.u32 %v369_v0, %v365_v30  ;;  %v558_v38 = vsel %vm2671_vm5, %v553_v33, %v557_v28  ;;  %v361_v42 = vrot.slane %v360_v29, 4  ;;  %v375_v44 = vrot.slane %v373_v32, 5 }
  0x36   : > { %1032 = vrot.lane.b32.xlu0 %v2759_v1, %s2544_s22  ;;  %v563_v40 = vrot.slane %v562_v3, 4  ;;  %v2249_v39 = vrot.slane %v2710_v35, 9  ;;  %v814_v46 = vrot.slane %v812_v36, 4  ;;  %v815_v47 = vrot.slane %v280_v60, 5 }
  0x37   : > { %1182 = vrot.lane.b32.xlu1 %v2735_v57, %s2545_s23  ;;  %v371_v43 = vrot.slane %v370_v31, 4  ;;  %v366_v35 = vsel %vm2671_vm5, %v361_v42, %v365_v30  ;;  %v756_v59 = vrot.slane %v2727_v50, 5  ;;  %v570_v60 = vshrl.u32 %v2778_v52, 16  ;;  %v259_v42 = vld [vmem:[%s2594_s19 + $0x2c] sm:$0x1] }
  0x38   : > { %v568_v45 = vsel %vm2671_vm5, %v563_v40, %v567_v34  ;;  %v813_v56 = vsel %vm2626_vm4, %v2249_v39, %v812_v36  ;;  %v816_v15 = vsel %vm2626_vm4, %v814_v46, %v815_v47  ;;  %v573_v61 = vshll.u32 %v2778_v52, 16  ;;  %v2511_v46 = vld [vmem:[%s3844_s1] sm:$0xff]  }
  0x39   : > { %v2775_v48 = vcombine.low %v558_v38, %v568_v45  ;;  %v376_v55 = vsel %vm2671_vm5, %v371_v43, %v375_v44  ;;  %v583_v62 = vshrl.u32 %v2781_v53, 16  ;;  %v579_v63 = vshll.u32 %v2781_v53, 16  ;;  %2418 = vmatprep.subr.bf16.mxu0 %v2511_v46  ;;  %2456 = vmatprep.subr.bf16.mxu1 %v2511_v46 }
  0x3a   : > { %1133 = vrot.lane.b32.xlu0 %v2766_v37, %s2542_s20  ;;  %v2802_v2 = vcombine.low %v366_v35, %v376_v55  ;;  %v2241_v7 = vrot.slane %v2724_v49, 9  ;;  %v2807_v50 = vcombine.low %v813_v56, %v816_v15  ;;  %v758_v8 = vrot.slane %v756_v59, 4  ;;  %2419 = vmatpush3.bf16.msra.mxu0 %v2511_v46 }
  0x3b   : > { %1184 = vrot.lane.b32.xlu1 %v2775_v48, %s2545_s23  ;;  %v759_v11 = vrot.slane %v2751_v20, 5  ;;  %v572_v18 = vrot.slane %v570_v60, 4  ;;  %v575_v19 = vrot.slane %v573_v61, 5  ;;  %v585_v21 = vrot.slane %v583_v62, 4  ;;  %2459 = vmatpush3.bf16.msra.mxu1 %v2511_v46  ;;  %v2512_v60 = vld [vmem:[%s3844_s1 + $0x8] sm:$0xff]  }
  0x3c   : > { %v757_v49 = vsel %vm2626_vm4, %v2241_v7, %v756_v59  ;;  %v378_v26 = vshrl.u32 %v2811_v13, 16  ;;  %v381_v25 = vshll.u32 %v2811_v13, 16  ;;  %v391_v27 = vshrl.u32 %v2814_v17, 16  ;;  %2420 = vmatprep.subr.bf16.mxu0 %v2512_v60  ;;  %2457 = vmatprep.subr.bf16.mxu1 %v2512_v60 }
  0x3d   : > { %v760_v20 = vsel %vm2626_vm4, %v758_v8, %v759_v11  ;;  %v387_v28 = vshll.u32 %v2814_v17, 16  ;;  %v576_v0 = vor.u32 %v575_v19, %v572_v18  ;;  %v589_v29 = vshll.u32 %v2817_v23, 16 }
  0x3e   : > { %1166 = vrot.lane.b32.xlu0 %v2701_v5, %s2545_s23  ;;  %v581_v5 = vrot.slane %v579_v63, 5  ;;  %v2834_v30 = vcombine.low %v757_v49, %v760_v20  ;;  %v2838_v32 = vcombine.low %v2778_v52, %v2781_v53  ;;  %v380_v33 = vrot.slane %v378_v26, 4  ;;  %2421 = vmatpush3.bf16.msra.mxu0 %v2512_v60  ;;  %v2905_v49 = vld [vmem:[%s2594_s19 + $0x90] sm:$0xf]  ;;  %v2908_v26 = vld [vmem:[%s2594_s19 + $0x94] sm:$0xf] }
  0x3f   : > { %1217 = vrot.lane.b32.xlu1 %v2675_v54, %s2546_s24  ;;  %v383_v3 = vrot.slane %v381_v25, 5  ;;  %v389_v34 = vrot.slane %v387_v28, 5  ;;  %v393_v31 = vrot.slane %v391_v27, 4  ;;  %v577_v36 = vrot.slane %v576_v0, 4  ;;  %2460 = vmatpush3.bf16.msra.mxu1 %v2512_v60  ;;  %v2928_v0 = vld [vmem:[%s2594_s19 + $0x34] sm:$0xf] }
  0x40   : > { %v586_v6 = vor.u32 %v585_v21, %v581_v5  ;;  %v591_v40 = vrot.slane %v589_v29, 5  ;;  %v397_v44 = vshll.u32 %v259_v42, 16  ;;  %v2858_v47 = vcombine.low %v2811_v13, %v2814_v17  ;;  %v262_v60 = vld [vmem:[%s2594_s19 + $0x38] sm:$0x1] }
  0x41   : > { %v394_v43 = vor.u32 %v393_v31, %v389_v34  ;;  %v582_v39 = vsel %vm2671_vm5, %v577_v36, %v581_v5  ;;  %v819_v15 = vrot.slane %v2781_v53, 5  ;;  %v2250_v53 = vrot.slane %v2778_v52, 9 }
  0x42   : > { %1168 = vrot.lane.b32.xlu0 %v2802_v2, %s2545_s23  ;;  %v587_v38 = vrot.slane %v586_v6, 4  ;;  %3860 = vst [vmem:[#allocation4_spill] sm:$0xff] %v2858_v47  ;;  %v399_v59 = vrot.slane %v397_v44, 5  ;;  %v822_v7 = vrot.slane %v2817_v23, 5  ;;  %v763_v11 = vrot.slane %v2814_v17, 5 }
  0x43   : > { %1219 = vrot.lane.b32.xlu1 %v2807_v50, %s2546_s24  ;;  %v395_v56 = vrot.slane %v394_v43, 4  ;;  %v821_v63 = vrot.slane %v819_v15, 4  ;;  %v820_v52 = vsel %vm2626_vm4, %v2250_v53, %v819_v15  ;;  %v2242_v5 = vrot.slane %v2811_v13, 9  ;;  %v2515_v44 = vld [vmem:[%s3844_s1 + $0x10] ss:$0 sps:$4 sm:$0x33]  }
  0x44   : > { %v592_v45 = vsel %vm2671_vm5, %v587_v38, %v591_v40  ;;  %v765_v21 = vrot.slane %v763_v11, 4  ;;  %v766_v23 = vrot.slane %v259_v42, 5  ;;  %v594_v20 = vshrl.u32 %v2905_v49, 16  ;;  %2462 = vmatprep.subr.msk.bf16.mxu0 %vm1671_vm6, %v2515_v44  ;;  %2463 = vmatprep.subr.msk.bf16.mxu1 %vm1671_vm6, %v2515_v44 }
  0x45   : > { %v2862_v35 = vcombine.low %v582_v39, %v592_v45  ;;  %v400_v62 = vsel %vm2671_vm5, %v395_v56, %v399_v59  ;;  %v823_v18 = vsel %vm2626_vm4, %v821_v63, %v822_v7  ;;  %v764_v17 = vsel %vm2626_vm4, %v2242_v5, %v763_v11 }
  0x46   : > { %1201 = vrot.lane.b32.xlu0 %v2681_v58, %s2546_s24  ;;  %v384_v58 = vor.u32 %v383_v3, %v380_v33  ;;  %v2893_v19 = vcombine.low %v820_v52, %v823_v18  ;;  %v597_v25 = vshll.u32 %v2905_v49, 16  ;;  %v607_v27 = vshrl.u32 %v2908_v26, 16 }
  0x47   : > { %1252 = vrot.lane.b32.xlu1 %v2747_v9, %s2547_s25  ;;  %v603_v28 = vshll.u32 %v2908_v26, 16  ;;  %v596_v6 = vrot.slane %v594_v20, 4  ;;  %v411_v38 = vshll.u32 %v2928_v0, 16  ;;  %v2943_v43 = vcombine.low %v2905_v49, %v2908_v26  ;;  %v2972_v20 = vld [vmem:[%s2594_s19 + $0x9c] sm:$0xf] }
  0x48   : > { %v385_v55 = vrot.slane %v384_v58, 4  ;;  %v599_v29 = vrot.slane %v597_v25, 5  ;;  %v609_v3 = vrot.slane %v607_v27, 4  ;;  %v421_v53 = vshll.u32 %v262_v60, 16  ;;  %v2975_v25 = vld [vmem:[%s2594_s19 + $0xa0] sm:$0xf] }
  0x49   : > { %v605_v33 = vrot.slane %v603_v28, 5  ;;  %3861 = vst [vmem:[#allocation5_spill] sm:$0xff] %v2943_v43  ;;  %v413_v46 = vrot.slane %v411_v38, 5  ;;  %v826_v11 = vrot.slane %v2908_v26, 5  ;;  %v2251_v18 = vrot.slane %v2905_v49, 9 }
  0x4a   : > { %1203 = vrot.lane.b32.xlu0 %v2834_v30, %s2546_s24  ;;  %v390_v61 = vsel %vm2671_vm5, %v385_v55, %v389_v34  ;;  %v286_v34 = vld [vmem:[%s2594_s19 + $0x98] sm:$0x1]  ;;  %v600_v40 = vor.u32 %v599_v29, %v596_v6  ;;  %v770_v27 = vrot.slane %v2928_v0, 5  ;;  %v618_v6 = vshrl.u32 %v2972_v20, 16 }
  0x4b   : > { %1254 = vrot.lane.b32.xlu1 %v2838_v32, %s2547_s25  ;;  %v2880_v8 = vcombine.low %v390_v61, %v400_v62  ;;  %v610_v42 = vor.u32 %v609_v3, %v605_v33  ;;  %v613_v58 = vshll.u32 %v286_v34, 16  ;;  %v829_v26 = vrot.slane %v286_v34, 5 }
  0x4c   : > { %v601_v56 = vrot.slane %v600_v40, 4  ;;  %v827_v28 = vsel %vm2626_vm4, %v2251_v18, %v826_v11  ;;  %v627_v3 = vshll.u32 %v2975_v25, 16  ;;  %v3004_v40 = vld [vmem:[%s2594_s19 + $0x3c] sm:$0xf] }
  0x4d   : > { %v611_v59 = vrot.slane %v610_v42, 4  ;;  %v615_v15 = vrot.slane %v613_v58, 5  ;;  %v3007_v42 = vld [vmem:[%s2594_s19 + $0x40] sm:$0xf]  ;;  %v620_v58 = vrot.slane %v618_v6, 4 }
  0x4e   : > { %1236 = vrot.lane.b32.xlu0 %v2766_v37, %s2547_s25  ;;  %v606_v63 = vsel %vm2671_vm5, %v601_v56, %v605_v33  ;;  %v631_v33 = vshrl.u32 %v2975_v25, 16  ;;  %v439_v56 = vshrl.u32 %v3007_v42, 16 }
  0x4f   : > { %1287 = vrot.lane.b32.xlu1 %v2775_v48, %s2548_s28  ;;  %v616_v7 = vsel %vm2671_vm5, %v611_v59, %v615_v15  ;;  %v435_v59 = vshll.u32 %v3007_v42, 16 }
  0x50   : > { %v2969_v5 = vcombine.low %v606_v63, %v616_v7 }
  0x51   : > { %v437_v7 = vrot.slane %v435_v59, 5 }
  0x52   : > { %1238 = vrot.lane.b32.xlu0 %v2858_v47, %s2547_s25 }
  0x53   : > { %1289 = vrot.lane.b32.xlu1 %v2862_v35, %s2548_s28 }
  0x56   : > { %1271 = vrot.lane.b32.xlu0 %v2802_v2, %s2548_s28 }
  0x57   : > { %1322 = vrot.lane.b32.xlu1 %v2807_v50, %s2549_s4 }
  0x5a   : > { %1273 = vrot.lane.b32.xlu0 %v2880_v8, %s2548_s28 }
  0x5b   : > { %1036 = vrot.lane.b32.xlu1 %v2775_v48, %s2544_s22  ;;  %v767_v48 = vsel %vm2626_vm4, %v765_v21, %v766_v23 }
  0x5c   : > { %v2912_v13 = vcombine.low %v764_v17, %v767_v48  ;;  %v423_v17 = vrot.slane %v421_v53, 5  ;;  %v828_v48 = vrot.slane %v826_v11, 4  ;;  %v441_v11 = vrot.slane %v439_v56, 4 }
  0x5e   : > { %1306 = vrot.lane.b32.xlu0 %v2834_v30, %s2549_s4  ;;  %v830_v29 = vsel %vm2626_vm4, %v828_v48, %v829_v26  ;;  %v442_v26 = vor.u32 %v441_v11, %v437_v7 }
  0x5f   : > { %1324 = vrot.lane.b32.xlu1 %v2893_v19, %s2549_s4  ;;  %v3001_v38 = vcombine.low %v827_v28, %v830_v29  ;;  %v3047_v28 = vcombine.low %v3004_v40, %v3007_v42 }
  0x61   : > { %3864 = vst [vmem:[#allocation8_spill] sm:$0xff] %v3047_v28 }
  0x62   : > { %1020 = vrot.lane.b32.xlu0 %v2802_v2, %s2544_s22  ;;  %v2925_v2 = vld [vmem:[%s2594_s19 + $0x30] sm:$0xf] }
  0x63   : > { %1038 = vrot.lane.b32.xlu1 %v2862_v35, %s2544_s22  ;;  %v402_v31 = vshrl.u32 %v2925_v2, 16  ;;  %v405_v36 = vshll.u32 %v2925_v2, 16  ;;  %v2964_v52 = vcombine.low %v2925_v2, %v2928_v0 }
  0x65   : > { %v404_v39 = vrot.slane %v402_v31, 4  ;;  %v407_v45 = vrot.slane %v405_v36, 5  ;;  %3862 = vst [vmem:[#allocation6_spill] sm:$0xff] %v2964_v52  ;;  %v2243_v31 = vrot.slane %v2925_v2, 9  ;;  %v772_v36 = vrot.slane %v770_v27, 4 }
  0x66   : > { %1308 = vrot.lane.b32.xlu0 %v2912_v13, %s2549_s4 }
  0x67   : > { %1116 = vrot.lane.b32.xlu1 %v2807_v50, %s2543_s21  ;;  %v415_v50 = vshrl.u32 %v2928_v0, 16  ;;  %v408_v61 = vor.u32 %v407_v45, %v404_v39  ;;  %v621_v0 = vshll.u32 %v2972_v20, 16  ;;  %v629_v39 = vrot.slane %v627_v3, 5 }
  0x68   : > { %v633_v45 = vrot.slane %v631_v33, 4  ;;  %v771_v2 = vsel %vm2626_vm4, %v2243_v31, %v770_v27  ;;  %v833_v31 = vrot.slane %v2975_v25, 5 }
  0x69   : > { %v417_v55 = vrot.slane %v415_v50, 4  ;;  %v409_v21 = vrot.slane %v408_v61, 4  ;;  %v773_v50 = vrot.slane %v262_v60, 5 }
  0x6a   : > { %1022 = vrot.lane.b32.xlu0 %v2880_v8, %s2544_s22  ;;  %v634_v60 = vor.u32 %v633_v45, %v629_v39 }
  0x6b   : > { %1118 = vrot.lane.b32.xlu1 %v2893_v19, %s2543_s21  ;;  %v418_v62 = vor.u32 %v417_v55, %v413_v46  ;;  %v429_v55 = vshll.u32 %v3004_v40, 16 }
  0x6d   : > { %v419_v23 = vrot.slane %v418_v62, 4  ;;  %v3028_v62 = vcombine.low %v2972_v20, %v2975_v25  ;;  %v431_v63 = vrot.slane %v429_v55, 5 }
  0x6e   : > { %1100 = vrot.lane.b32.xlu0 %v2834_v30, %s2543_s21  ;;  %v1673_v30 = vsel %vm1671_vm6, %v2515_v44, 0  ;;  %v623_v44 = vrot.slane %v621_v0, 5  ;;  %v443_v0 = vrot.slane %v442_v26, 4 }
  0x6f   : > { %1151 = vrot.lane.b32.xlu1 %v2838_v32, %s2542_s20  ;;  %2423 = vmatpush3.bf16.msra.mxu0 %v1673_v30  ;;  %v424_v49 = vsel %vm2671_vm5, %v419_v23, %v423_v17  ;;  %3863 = vst [vmem:[#allocation7_spill] sm:$0xff] %v3028_v62  ;;  %v265_v17 = vld [vmem:[%s2594_s19 + $0x44] sm:$0x1] }
  0x70   : > { %2461 = vmatpush3.bf16.msra.mxu1 %v1673_v30  ;;  %v624_v15 = vor.u32 %v623_v44, %v620_v58  ;;  %v445_v27 = vshll.u32 %v265_v17, 16  ;;  %v2252_v44 = vrot.slane %v2972_v20, 9 }
  0x72   : > { %1102 = vrot.lane.b32.xlu0 %v2912_v13, %s2543_s21  ;;  %v625_v18 = vrot.slane %v624_v15, 4  ;;  %v447_v33 = vrot.slane %v445_v27, 5  ;;  %v834_v20 = vsel %vm2626_vm4, %v2252_v44, %v833_v31  ;;  %v780_v15 = vrot.slane %v265_v17, 5  ;;  %v3133_v27 = vld [vmem:[%s2594_s19 + $0x4c] sm:$0xf] }
  0x73   : > { %1153 = vrot.lane.b32.xlu1 %v2943_v43, %s2542_s20  ;;  %v459_v44 = vshll.u32 %v3133_v27, 16 }
  0x74   : > { %v448_v58 = vsel %vm2671_vm5, %v443_v0, %v447_v33 }
  0x76   : > { %1135 = vrot.lane.b32.xlu0 %v2858_v47, %s2542_s20 }
  0x77   : > { %1186 = vrot.lane.b32.xlu1 %v2862_v35, %s2545_s23  ;;  %v414_v35 = vsel %vm2671_vm5, %v409_v21, %v413_v46  ;;  %v426_v46 = vshrl.u32 %v3004_v40, 16  ;;  %v635_v21 = vrot.slane %v634_v60, 4 }
  0x78   : > { %v2996_v34 = vcombine.low %v414_v35, %v424_v49  ;;  %v630_v35 = vsel %vm2671_vm5, %v625_v18, %v629_v39  ;;  %v835_v39 = vrot.slane %v833_v31, 4  ;;  %v292_v31 = vld [vmem:[%s2594_s19 + $0xb0] sm:$0x1] }
  0x79   : > { %v428_v53 = vrot.slane %v426_v46, 4  ;;  %v777_v46 = vrot.slane %v3007_v42, 5  ;;  %v2244_v42 = vrot.slane %v3004_v40, 9  ;;  %v3104_v40 = vld [vmem:[%s2594_s19 + $0xa8] sm:$0xf] }
  0x7a   : > { %1137 = vrot.lane.b32.xlu0 %v2964_v52, %s2542_s20  ;;  %v642_v18 = vshrl.u32 %v3104_v40, 16 }
  0x7b   : > { %1188 = vrot.lane.b32.xlu1 %v2969_v5, %s2545_s23  ;;  %v432_v48 = vor.u32 %v431_v63, %v428_v53  ;;  %v779_v59 = vrot.slane %v777_v46, 4  ;;  %v3107_v63 = vld [vmem:[%s2594_s19 + $0xac] sm:$0xf] }
  0x7c   : > { %v651_v17 = vshll.u32 %v3107_v63, 16 }
  0x7d   : > { %v433_v29 = vrot.slane %v432_v48, 4 }
  0x7e   : > { %1170 = vrot.lane.b32.xlu0 %v2880_v8, %s2545_s23  ;;  %v289_v8 = vld [vmem:[%s2594_s19 + $0xa4] sm:$0x1] }
  0x7f   : > { %1221 = vrot.lane.b32.xlu1 %v2893_v19, %s2546_s24  ;;  %v774_v19 = vsel %vm2626_vm4, %v772_v36, %v773_v50  ;;  %v637_v30 = vshll.u32 %v289_v8, 16  ;;  %v438_v50 = vsel %vm2671_vm5, %v433_v29, %v437_v7  ;;  %v836_v45 = vrot.slane %v289_v8, 5 }
  0x80   : > { %v3024_v61 = vcombine.low %v771_v2, %v774_v19  ;;  %v3071_v25 = vcombine.low %v438_v50, %v448_v58  ;;  %v653_v29 = vrot.slane %v651_v17, 5  ;;  %v463_v58 = vshrl.u32 %v3133_v27, 16 }
  0x81   : > { %v639_v23 = vrot.slane %v637_v30, 5  ;;  %v837_v8 = vsel %vm2626_vm4, %v835_v39, %v836_v45  ;;  %v778_v30 = vsel %vm2626_vm4, %v2244_v42, %v777_v46  ;;  %v3154_v42 = vcombine.low %v3104_v40, %v3107_v63 }
  0x82   : > { %1172 = vrot.lane.b32.xlu0 %v2996_v34, %s2545_s23  ;;  %v3088_v56 = vcombine.low %v834_v20, %v837_v8  ;;  %v661_v20 = vshll.u32 %v292_v31, 16 }
  0x83   : > { %1223 = vrot.lane.b32.xlu1 %v3001_v38, %s2546_s24  ;;  %v640_v49 = vsel %vm2671_vm5, %v635_v21, %v639_v23  ;;  %v645_v21 = vshll.u32 %v3104_v40, 16  ;;  %v655_v23 = vshrl.u32 %v3107_v63, 16 }
  0x84   : > { %v3051_v6 = vcombine.low %v630_v35, %v640_v49  ;;  %v644_v35 = vrot.slane %v642_v18, 4  ;;  %v663_v17 = vrot.slane %v661_v20, 5 }
  0x85   : > { %v647_v49 = vrot.slane %v645_v21, 5  ;;  %v657_v0 = vrot.slane %v655_v23, 4 }
  0x86   : > { %1205 = vrot.lane.b32.xlu0 %v2912_v13, %s2546_s24 }
  0x87   : > { %1256 = vrot.lane.b32.xlu1 %v2943_v43, %s2547_s25  ;;  %v648_v45 = vor.u32 %v647_v49, %v644_v35  ;;  %v658_v46 = vor.u32 %v657_v0, %v653_v29  ;;  %v3161_v35 = vld [vmem:[%s2594_s19 + $0x50] sm:$0x1] }
  0x89   : > { %v3037_v13 = vpop.permute.xlu1 %1147  ;;  %v649_v21 = vrot.slane %v648_v45, 4  ;;  %v659_v23 = vrot.slane %v658_v46, 4  ;;  %v840_v45 = vrot.slane %v3107_v63, 5 }
  0x8a   : > { %1207 = vrot.lane.b32.xlu0 %v3024_v61, %s2546_s24 }
  0x8b   : > { %1258 = vrot.lane.b32.xlu1 %v3028_v62, %s2547_s25  ;;  %v3053_v3 = vpop.permute.xlu0 %1131 }
  0x8e   : > { %1240 = vrot.lane.b32.xlu0 %v2964_v52, %s2547_s25  ;;  %v3198_v52 = vld [vmem:[%s2594_s19 + $0xb8] sm:$0xf] }
  0x8f   : > { %1291 = vrot.lane.b32.xlu1 %v2969_v5, %s2548_s28 }
  0x91   : > { %v3056_v36 = vpop.permute.xlu1 %1112 }
  0x92   : > { %1242 = vrot.lane.b32.xlu0 %v3047_v28, %s2547_s25 }
  0x93   : > { %1293 = vrot.lane.b32.xlu1 %v3051_v6, %s2548_s28  ;;  %v3073_v19 = vpop.permute.xlu0 %1096 }
  0x95   : > { %v3067_v2 = vpop.permute.xlu1 %1114 }
  0x96   : > { %1275 = vrot.lane.b32.xlu0 %v2996_v34, %s2548_s28 }
  0x97   : > { %1326 = vrot.lane.b32.xlu1 %v3001_v38, %s2549_s4  ;;  %v3091_v60 = vpop.permute.xlu0 %1098 }
  0x9a   : > { %1277 = vrot.lane.b32.xlu0 %v3071_v25, %s2548_s28  ;;  %v3086_v55 = vpop.permute.xlu1 %1018 }
  0x9b   : > { %1040 = vrot.lane.b32.xlu1 %v2969_v5, %s2544_s22  ;;  %v781_v5 = vsel %vm2626_vm4, %v779_v59, %v780_v15 }
  0x9c   : > { %v3113_v11 = vcombine.low %v778_v30, %v781_v5  ;;  %v461_v30 = vrot.slane %v459_v44, 5  ;;  %v465_v5 = vrot.slane %v463_v58, 4  ;;  %v654_v58 = vsel %vm2671_vm5, %v649_v21, %v653_v29 }
  0x9d   : > { %v664_v44 = vsel %vm2671_vm5, %v659_v23, %v663_v17  ;;  %v842_v23 = vrot.slane %v840_v45, 4  ;;  %v843_v17 = vrot.slane %v292_v31, 5 }
  0x9e   : > { %1310 = vrot.lane.b32.xlu0 %v3024_v61, %s2549_s4  ;;  %v466_v0 = vor.u32 %v465_v5, %v461_v30  ;;  %v3188_v29 = vcombine.low %v654_v58, %v664_v44  ;;  %v679_v58 = vshrl.u32 %v3198_v52, 16 }
  0x9f   : > { %1328 = vrot.lane.b32.xlu1 %v3088_v56, %s2549_s4  ;;  %v3111_v7 = vpop.permute.xlu0 %1016 }
  0xa0   : > { %v467_v5 = vrot.slane %v466_v0, 4 }
  0xa1   : > { %v3101_v53 = vpop.permute.xlu1 %1034 }
  0xa2   : > { %1024 = vrot.lane.b32.xlu0 %v2996_v34, %s2544_s22  ;;  %v3128_v34 = vld [vmem:[%s2594_s19 + $0x48] sm:$0xf] }
  0xa3   : > { %1042 = vrot.lane.b32.xlu1 %v3051_v6, %s2544_s22  ;;  %v453_v50 = vshll.u32 %v3128_v34, 16  ;;  %v3183_v20 = vcombine.low %v3128_v34, %v3133_v27 }
  0xa5   : > { %v3121_v48 = vpop.permute.xlu1 %1149  ;;  %v455_v15 = vrot.slane %v453_v50, 5 }
  0xa6   : > { %1312 = vrot.lane.b32.xlu0 %v3113_v11, %s2549_s4 }
  0xa7   : > { %1120 = vrot.lane.b32.xlu1 %v3001_v38, %s2543_s21  ;;  %v450_v38 = vshrl.u32 %v3128_v34, 16 }
  0xa8   : > { %v3130_v26 = vpop.permute.xlu0 %1032 }
  0xa9   : > { %v3135_v33 = vpop.permute.xlu1 %1182  ;;  %v452_v59 = vrot.slane %v450_v38, 4  ;;  %v469_v38 = vshll.u32 %v3161_v35, 16 }
  0xaa   : > { %1026 = vrot.lane.b32.xlu0 %v3071_v25, %s2544_s22 }
  0xab   : > { %1122 = vrot.lane.b32.xlu1 %v3088_v56, %s2543_s21  ;;  %v471_v21 = vrot.slane %v469_v38, 5 }
  0xac   : > { %v3146_v39 = vpop.permute.xlu0 %1133 }
  0xad   : > { %v3148_v8 = vpop.permute.xlu1 %1184 }
  0xae   : > { %1104 = vrot.lane.b32.xlu0 %v3024_v61, %s2543_s21  ;;  %v456_v61 = vor.u32 %v455_v15, %v452_v59  ;;  %v2253_v59 = vrot.slane %v3104_v40, 9  ;;  %v3202_v40 = vcombine.low %v2614_v12, %v2619_v14 }
  0xaf   : > { %1155 = vrot.lane.b32.xlu1 %v3028_v62, %s2542_s20  ;;  %v3193_v62 = vld [vmem:[%s2594_s19 + $0xb4] sm:$0xf] }
  0xb0   : > { %v3158_v18 = vpop.permute.xlu0 %1166  ;;  %v457_v15 = vrot.slane %v456_v61, 4  ;;  %v472_v61 = vsel %vm2671_vm5, %v467_v5, %v471_v21  ;;  %v841_v0 = vsel %vm2626_vm4, %v2253_v59, %v840_v45  ;;  %v666_v12 = vshrl.u32 %v3193_v62, 16 }
  0xb1   : > { %v3163_v49 = vpop.permute.xlu1 %1217  ;;  %v669_v38 = vshll.u32 %v3193_v62, 16  ;;  %v787_v5 = vrot.slane %v3161_v35, 5  ;;  %v2257_v21 = vcombine.low %v2636_v22, %v2639_v24  ;;  %v681_v22 = vrot.slane %v679_v58, 4 }
  0xb2   : > { %1106 = vrot.lane.b32.xlu0 %v3113_v11, %s2543_s21  ;;  %v462_v31 = vsel %vm2671_vm5, %v457_v15, %v461_v30  ;;  %v675_v30 = vshll.u32 %v3198_v52, 16  ;;  %v2245_v15 = vrot.slane %v3128_v34, 9  ;;  %v668_v35 = vrot.slane %v666_v12, 4 }
  0xb3   : > { %1157 = vrot.lane.b32.xlu1 %v3154_v42, %s2542_s20  ;;  %v3228_v45 = vcombine.low %v462_v31, %v472_v61  ;;  %v3246_v31 = vld [vmem:[%s2594_s19 + $0x58] sm:$0xf]  ;;  %v671_v61 = vrot.slane %v669_v38, 5  ;;  %v3277_v57 = vcombine.low %v3193_v62, %v3198_v52  ;;  %v1341_v47 = vsel %vm1338_vm7, %v2257_v21, %v3111_v7 }
  0xb4   : > { %v3170_v50 = vpop.permute.xlu0 %1168  ;;  %v3248_v43 = vrot.slane %v675_v30, 5  ;;  %v483_v58 = vshll.u32 %v3246_v31, 16 }
  0xb5   : > { %v3177_v46 = vpop.permute.xlu1 %1219  ;;  %v672_v30 = vor.u32 %v671_v61, %v668_v35 }
  0xb6   : > { %1139 = vrot.lane.b32.xlu0 %v3047_v28, %s2542_s20 }
  0xb7   : > { %1190 = vrot.lane.b32.xlu1 %v3051_v6, %s2545_s23  ;;  %v784_v6 = vrot.slane %v3133_v27, 5  ;;  %v844_v27 = vsel %vm2626_vm4, %v842_v23, %v843_v17  ;;  %v1365_v23 = vsel %vm1338_vm7, %v3202_v40, %v3130_v26  ;;  %v3241_v17 = vld [vmem:[%s2594_s19 + $0x54] sm:$0xf]  ;;  %v3253_v26 = vld [vmem:[%s2594_s19 + $0xbc] sm:$0x1] }
  0xb8   : > { %v3190_v63 = vpop.permute.xlu0 %1201  ;;  %v3238_v34 = vcombine.low %v841_v0, %v844_v27  ;;  %v1405_v0 = vsel %vm1387_vm8, %v1365_v23, %v3056_v36  ;;  %v474_v27 = vshrl.u32 %v3241_v17, 16  ;;  %v477_v38 = vshll.u32 %v3241_v17, 16 }
  0xb9   : > { %v3195_v28 = vpop.permute.xlu1 %1252  ;;  %v786_v59 = vrot.slane %v784_v6, 4 }
  0xba   : > { %1141 = vrot.lane.b32.xlu0 %v3183_v20, %s2542_s20  ;;  %v476_v61 = vrot.slane %v474_v27, 4 }
  0xbb   : > { %1192 = vrot.lane.b32.xlu1 %v3188_v29, %s2545_s23  ;;  %v788_v12 = vsel %vm2626_vm4, %v786_v59, %v787_v5  ;;  %v685_v59 = vshll.u32 %v3253_v26, 16  ;;  %v1438_v5 = vsel %vm1420_vm9, %v1405_v0, %v3037_v13  ;;  %v3292_v0 = vrot.slane %v483_v58, 5 }
  0xbc   : > { %v3216_v14 = vpop.permute.xlu0 %1203  ;;  %v1471_v35 = vsel %vm1453_vm10, %v1438_v5, %v3135_v33 }
  0xbd   : > { %v3223_v44 = vpop.permute.xlu1 %1254  ;;  %v1504_v13 = vsel %vm1486_vm11, %v1471_v35, %v3163_v49  ;;  %v687_v27 = vrot.slane %v685_v59, 5  ;;  %v1368_v49 = vsel %vm1338_vm7, %v2606_v4, %v3101_v53 }
  0xbe   : > { %1174 = vrot.lane.b32.xlu0 %v3071_v25, %s2545_s23  ;;  %v1537_v33 = vsel %vm1519_vm12, %v1504_v13, %v3195_v28 }
  0xbf   : > { %1225 = vrot.lane.b32.xlu1 %v3088_v56, %s2546_s24  ;;  %v785_v56 = vsel %vm2626_vm4, %v2245_v15, %v784_v6  ;;  %v487_v6 = vshrl.u32 %v3246_v31, 16  ;;  %v682_v15 = vor.u32 %v681_v22, %v3248_v43  ;;  %v479_v22 = vrot.slane %v477_v38, 5 }
  0xc0   : > { %v3243_v25 = vpop.permute.xlu0 %1236  ;;  %v3273_v23 = vcombine.low %v785_v56, %v788_v12  ;;  %v3290_v56 = vld [vmem:[%s2594_s19 + $0x5c] sm:$0x1]  ;;  %v673_v12 = vrot.slane %v672_v30, 4  ;;  %v1389_v38 = vsel %vm1387_vm8, %v1341_v47, %v3073_v19  ;;  %v1407_v19 = vsel %vm1387_vm8, %v1368_v49, %v3067_v2 }
  0xc1   : > { %v1288_v24 = vpop.permute.xlu1 %1287  ;;  %v489_v7 = vrot.slane %v487_v6, 4  ;;  %v480_v28 = vor.u32 %v479_v22, %v476_v61  ;;  %v493_v58 = vshll.u32 %v3290_v56, 16  ;;  %v1422_v53 = vsel %vm1420_vm9, %v1389_v38, %v3053_v3 }
  0xc2   : > { %1176 = vrot.lane.b32.xlu0 %v3228_v45, %s2545_s23  ;;  %v1570_v5 = vsel %vm1552_vm13, %v1537_v33, %v1288_v24  ;;  %v678_v30 = vsel %vm2671_vm5, %v673_v12, %v3248_v43  ;;  %v1440_v59 = vsel %vm1420_vm9, %v1407_v19, %v3121_v48  ;;  %v1455_v61 = vsel %vm1453_vm10, %v1422_v53, %v3158_v18 }
  0xc3   : > { %1227 = vrot.lane.b32.xlu1 %v3238_v34, %s2546_s24  ;;  %v490_v47 = vor.u32 %v489_v7, %v3292_v0  ;;  %v3325_v2 = vcombine.low %v3241_v17, %v3246_v31  ;;  %v1473_v3 = vsel %vm1453_vm10, %v1440_v59, %v3148_v8  ;;  %v1488_v43 = vsel %vm1486_vm11, %v1455_v61, %v3190_v63 }
  0xc4   : > { %v3267_v36 = vpop.permute.xlu0 %1238  ;;  %v481_v13 = vrot.slane %v480_v28, 4  ;;  %v495_v48 = vrot.slane %v493_v58, 5  ;;  %v1506_v18 = vsel %vm1486_vm11, %v1473_v3, %v3177_v46  ;;  %v1521_v7 = vsel %vm1519_vm12, %v1488_v43, %v3243_v25  ;;  %v297_v43 = vld [vmem:[%s2594_s19 + $0xc4] sm:$0xf] }
  0xc5   : > { %v1290_v54 = vpop.permute.xlu1 %1289  ;;  %v491_v8 = vrot.slane %v490_v47, 4  ;;  %v1344_v63 = vsel %vm1338_vm7, %v2611_v10, %v3086_v55  ;;  %v1539_v12 = vsel %vm1519_vm12, %v1506_v18, %v3223_v44  ;;  %v847_v46 = vrot.slane %v3198_v52, 5 }
  0xc6   : > { %1209 = vrot.lane.b32.xlu0 %v3113_v11, %s2546_s24  ;;  %v683_v11 = vrot.slane %v682_v15, 4  ;;  %v1572_v25 = vsel %vm1552_vm13, %v1539_v12, %v1290_v54  ;;  %v1391_v55 = vsel %vm1387_vm8, %v1344_v63, %v3091_v60  ;;  %v486_v54 = vsel %vm2671_vm5, %v481_v13, %v3292_v0 }
  0xc7   : > { %1260 = vrot.lane.b32.xlu1 %v3154_v42, %s2547_s25  ;;  %v496_v52 = vsel %vm2671_vm5, %v491_v8, %v495_v48  ;;  %v1424_v44 = vsel %vm1420_vm9, %v1391_v55, %v3146_v39  ;;  %v849_v60 = vrot.slane %v847_v46, 4  ;;  %v866_v8 = vshrl.u32 %v297_v43, 16 }
  0xc8   : > { %v1272_v21 = vpop.permute.xlu0 %1271  ;;  %v688_v15 = vsel %vm2671_vm5, %v683_v11, %v687_v27  ;;  %v3380_v58 = vcombine.low %v486_v54, %v496_v52  ;;  %v862_v63 = vshll.u32 %v297_v43, 16 }
  0xc9   : > { %v1323_v35 = vpop.permute.xlu1 %1322  ;;  %v3341_v33 = vcombine.low %v678_v30, %v688_v15  ;;  %v1554_v11 = vsel %vm1552_vm13, %v1521_v7, %v1272_v21  ;;  %v794_v30 = vrot.slane %v3290_v56, 5  ;;  %v296_v56 = vld [vmem:[%s2594_s19 + $0xc0] sm:$0xf] }
  0xca   : > { %1211 = vrot.lane.b32.xlu0 %v3273_v23, %s2546_s24  ;;  %v1603_v6 = vsel %vm1585_vm14, %v1570_v5, %v1323_v35  ;;  %v2254_v5 = vrot.slane %v3193_v62, 9  ;;  %v850_v35 = vrot.slane %v3253_v26, 5  ;;  %v791_v62 = vrot.slane %v3246_v31, 5 }
  0xcb   : > { %1262 = vrot.lane.b32.xlu1 %v3277_v57, %s2547_s25  ;;  %2440 = vmatprep.mubr.msk.bf16.mxu1 %vm1638_vm15, %v1603_v6  ;;  %v1457_v6 = vsel %vm1453_vm10, %v1424_v44, %v3170_v50  ;;  %v853_v18 = vshrl.u32 %v296_v56, 16  ;;  %v856_v7 = vshll.u32 %v296_v56, 16  ;;  %v2305_v44 = vcombine.low %v296_v56, %v297_v43 }
  0xcc   : > { %v1274_v24 = vpop.permute.xlu0 %1273  ;;  %v1490_v0 = vsel %vm1486_vm11, %v1457_v6, %v3216_v14  ;;  %v848_v47 = vsel %vm2626_vm4, %v2254_v5, %v847_v46  ;;  %v851_v14 = vsel %vm2626_vm4, %v849_v60, %v850_v35  ;;  %v864_v46 = vrot.slane %v862_v63, 5 }
  0xcd   : > { %v3327_v22 = vpop.permute.xlu1 %1036  ;;  %v1523_v39 = vsel %vm1519_vm12, %v1490_v0, %v3267_v36  ;;  %v3400_v31 = vcombine.low %v848_v47, %v851_v14  ;;  %v2246_v36 = vrot.slane %v3241_v17, 9 }
  0xce   : > { %1244 = vrot.lane.b32.xlu0 %v3183_v20, %s2547_s25  ;;  %v1556_v50 = vsel %vm1552_vm13, %v1523_v39, %v1274_v24  ;;  %v793_v24 = vrot.slane %v791_v62, 4 }
  0xcf   : > { %1295 = vrot.lane.b32.xlu1 %v3188_v29, %s2548_s28 }
  0xd0   : > { %v1307_v27 = vpop.permute.xlu0 %1306  ;;  %v795_v61 = vsel %vm2626_vm4, %v793_v24, %v794_v30  ;;  %v3475_v30 = vld [vmem:[%s2594_s19 + $0xcc] sm:$0xf] }
  0xd1   : > { %v1587_v38 = vsel %vm1585_vm14, %v1554_v11, %v1307_v27  ;;  %v1325_v49 = vpop.permute.xlu1 %1324  ;;  %v855_v11 = vrot.slane %v853_v18, 4  ;;  %v858_v27 = vrot.slane %v856_v7, 5 }
  0xd2   : > { %1246 = vrot.lane.b32.xlu0 %v3325_v2, %s2547_s25  ;;  %2424 = vmatprep.mubr.msk.bf16.mxu0 %vm1638_vm15, %v1587_v38  ;;  %v1605_v10 = vsel %vm1585_vm14, %v1572_v25, %v1325_v49  ;;  %v868_v25 = vrot.slane %v866_v8, 4  ;;  %v298_v49 = vld [vmem:[%s2594_s19 + $0xc8] sm:$0x1] }
  0xd3   : > { %1297 = vrot.lane.b32.xlu1 %v3341_v33, %s2548_s28  ;;  %2441 = vmatmul.mubr.msk.bf16.vlgmr.msra.gmra.mrb[0].mxu1 %vm1638_vm15, %v1605_v10  ;;  %v859_v55 = vor.u32 %v858_v27, %v855_v11  ;;  %v884_v24 = vrot.slane %v298_v49, 5 }
  0xd4   : > { %v3368_v21 = vpop.permute.xlu0 %1020  ;;  %v869_v54 = vor.u32 %v868_v25, %v864_v46 }
  0xd5   : > { %v3374_v28 = vpop.permute.xlu1 %1038  ;;  %v860_v60 = vrot.slane %v859_v55, 4 }
  0xd6   : > { %1279 = vrot.lane.b32.xlu0 %v3228_v45, %s2548_s28  ;;  %v870_v35 = vrot.slane %v869_v54, 4 }
  0xd7   : > { %1330 = vrot.lane.b32.xlu1 %v3238_v34, %s2549_s4 }
  0xd8   : > { %v1309_v26 = vpop.permute.xlu0 %1308 }
  0xd9   : > { %v1589_v19 = vsel %vm1585_vm14, %v1556_v50, %v1309_v26  ;;  %v3393_v53 = vpop.permute.xlu1 %1116  ;;  %v881_v50 = vrot.slane %v297_v43, 5  ;;  %v890_v43 = vshll.u32 %v3475_v30, 16 }
  0xda   : > { %1281 = vrot.lane.b32.xlu0 %v3380_v58, %s2548_s28  ;;  %2425 = vmatmul.mubr.msk.bf16.vlgmr.msra.gmra.mrb[0].mxu0 %vm1638_vm15, %v1589_v19  ;;  %v2255_v19 = vrot.slane %v296_v56, 9 }
  0xdb   : > { %1044 = vrot.lane.b32.xlu1 %v3188_v29, %s2544_s22  ;;  %v792_v29 = vsel %vm2626_vm4, %v2246_v36, %v791_v62  ;;  %v883_v36 = vrot.slane %v881_v50, 4  ;;  %v892_v25 = vrot.slane %v890_v43, 5 }
  0xdc   : > { %v3404_v15 = vpop.permute.xlu0 %1022  ;;  %v3424_v13 = vcombine.low %v792_v29, %v795_v61  ;;  %v3478_v61 = vld [vmem:[%s2594_s19 + $0xd0] sm:$0xf]  ;;  %v882_v56 = vsel %vm2626_vm4, %v2255_v19, %v881_v50 }
  0xdd   : > { %v3406_v59 = vpop.permute.xlu1 %1118  ;;  %v885_v7 = vsel %vm2626_vm4, %v883_v36, %v884_v24  ;;  %v900_v8 = vshrl.u32 %v3478_v61, 16  ;;  %v896_v63 = vshll.u32 %v3478_v61, 16 }
  0xde   : > { %1314 = vrot.lane.b32.xlu0 %v3273_v23, %s2549_s4  ;;  %v3498_v27 = vcombine.low %v882_v56, %v885_v7 }
  0xdf   : > { %1332 = vrot.lane.b32.xlu1 %v3400_v31, %s2549_s4  ;;  %v898_v55 = vrot.slane %v896_v63, 5  ;;  %v902_v54 = vrot.slane %v900_v8, 4 }
  0xe0   : > { %v3416_v17 = vpop.permute.xlu0 %1100 }
  0xe1   : > { %v3418_v3 = vpop.permute.xlu1 %1151 }
  0xe2   : > { %1028 = vrot.lane.b32.xlu0 %v3228_v45, %s2544_s22 }
  0xe3   : > { %1046 = vrot.lane.b32.xlu1 %v3341_v33, %s2544_s22 }
  0xe4   : > { %v3428_v48 = vpop.permute.xlu0 %1102 }
  0xe5   : > { %v3430_v12 = vpop.permute.xlu1 %1153 }
  0xe6   : > { %1316 = vrot.lane.b32.xlu0 %v3424_v13, %s2549_s4 }
  0xe7   : > { %1124 = vrot.lane.b32.xlu1 %v3238_v34, %s2543_s21  ;;  %v872_v34 = vshll.u32 %v298_v49, 16 }
  0xe8   : > { %v3436_v45 = vpop.permute.xlu0 %1135 }
  0xe9   : > { %v3438_v38 = vpop.permute.xlu1 %1186  ;;  %v874_v6 = vrot.slane %v872_v34, 5 }
  0xea   : > { %1030 = vrot.lane.b32.xlu0 %v3380_v58, %s2544_s22 }
  0xeb   : > { %1126 = vrot.lane.b32.xlu1 %v3400_v31, %s2543_s21  ;;  %v875_v62 = vsel %vm2671_vm5, %v870_v35, %v874_v6 }
  0xec   : > { %v3445_v10 = vpop.permute.xlu0 %1137 }
  0xed   : > { %v3447_v52 = vpop.permute.xlu1 %1188 }
  0xee   : > { %1108 = vrot.lane.b32.xlu0 %v3273_v23, %s2543_s21  ;;  %v865_v23 = vsel %vm2671_vm5, %v860_v60, %v864_v46  ;;  %v3501_v60 = vld [vmem:[%s2594_s19 + $0xd4] sm:$0x1] }
  0xef   : > { %1159 = vrot.lane.b32.xlu1 %v3277_v57, %s2542_s20  ;;  %v3470_v47 = vcombine.low %v865_v23, %v875_v62  ;;  %v903_v23 = vor.u32 %v902_v54, %v898_v55  ;;  %v906_v62 = vshll.u32 %v3501_v60, 16  ;;  %v918_v54 = vrot.slane %v3501_v60, 5 }
  0xf0   : > { %v3453_v5 = vpop.permute.xlu0 %1170 }
  0xf1   : > { %v1222_v0 = vpop.permute.xlu1 %1221  ;;  %v904_v43 = vrot.slane %v903_v23, 4 }
  0xf2   : > { %1110 = vrot.lane.b32.xlu0 %v3424_v13, %s2543_s21 }
  0xf3   : > { %1161 = vrot.lane.b32.xlu1 %v2305_v44, %s2542_s20 }
  0xf4   : > { %v3458_v39 = vpop.permute.xlu0 %1172 }
  0xf5   : > { %v3464_v26 = vpop.permute.xlu1 %1223 }
  0xf6   : > { %1143 = vrot.lane.b32.xlu0 %v3325_v2, %s2542_s20 }
  0xf7   : > { %1194 = vrot.lane.b32.xlu1 %v3341_v33, %s2545_s23  ;;  %v887_v33 = vshrl.u32 %v3475_v30, 16 }
  0xf8   : > { %v3472_v14 = vpop.permute.xlu0 %1205 }
  0xf9   : > { %v1257_v29 = vpop.permute.xlu1 %1256  ;;  %v889_v46 = vrot.slane %v887_v33, 4 }
  0xfa   : > { %1145 = vrot.lane.b32.xlu0 %v3202_v40, %s2542_s20 }
  0xfb   : > { %1196 = vrot.lane.b32.xlu1 %v3470_v47, %s2545_s23 }
  0xfc   : > { %v3486_v18 = vpop.permute.xlu0 %1207 }
  0xfd   : > { %v1259_v11 = vpop.permute.xlu1 %1258 }
  0xfe   : > { %1178 = vrot.lane.b32.xlu0 %v3380_v58, %s2545_s23  ;;  %v1371_v58 = vsel %vm1338_vm7, %v2747_v9, %v3327_v22  ;;  %v2308_v22 = vcombine.low %v3475_v30, %v3478_v61 }
  0xff   : > { %1229 = vrot.lane.b32.xlu1 %v3400_v31, %s2546_s24  ;;  %v893_v31 = vor.u32 %v892_v25, %v889_v46  ;;  %v1409_v35 = vsel %vm1387_vm8, %v1371_v58, %v3393_v53 }
 0x100   : > { %v1241_v49 = vpop.permute.xlu0 %1240  ;;  %v1442_v50 = vsel %vm1420_vm9, %v1409_v35, %v3418_v3  ;;  %v908_v3 = vrot.slane %v906_v62, 5 }
 0x101   : > { %v1292_v34 = vpop.permute.xlu1 %1291  ;;  %v1475_v36 = vsel %vm1453_vm10, %v1442_v50, %v3438_v38  ;;  %v894_v53 = vrot.slane %v893_v31, 4 }
 0x102   : > { %1180 = vrot.lane.b32.xlu0 %v2759_v1, %s2545_s23  ;;  %v1508_v9 = vsel %vm1486_vm11, %v1475_v36, %v1222_v0  ;;  %v3867_v36 = vld [vmem:[#allocation2_spill] sm:$0xff] }
 0x103   : > { %1231 = vrot.lane.b32.xlu1 %v3498_v27, %s2546_s24  ;;  %v1541_v24 = vsel %vm1519_vm12, %v1508_v9, %v1257_v29  ;;  %v899_v29 = vsel %vm2671_vm5, %v894_v53, %v898_v55 }
 0x104   : > { %v3512_v6 = vpop.permute.xlu0 %1242  ;;  %v1574_v56 = vsel %vm1552_vm13, %v1541_v24, %v1292_v34 }
 0x105   : > { %v1294_v19 = vpop.permute.xlu1 %1293 }
 0x106   : > { %1213 = vrot.lane.b32.xlu0 %v3424_v13, %s2546_s24  ;;  %v1347_v13 = vsel %vm1338_vm7, %v2766_v37, %v3368_v21 }
 0x107   : > { %1264 = vrot.lane.b32.xlu1 %v2305_v44, %s2547_s25  ;;  %v1374_v44 = vsel %vm1338_vm7, %v2838_v32, %v3374_v28  ;;  %v1393_v0 = vsel %vm1387_vm8, %v1347_v13, %v3416_v17  ;;  %v909_v32 = vsel %vm2671_vm5, %v904_v43, %v908_v3  ;;  %v915_v28 = vrot.slane %v3478_v61, 5 }
 0x108   : > { %v1276_v33 = vpop.permute.xlu0 %1275  ;;  %v1411_v37 = vsel %vm1387_vm8, %v1374_v44, %v3406_v59  ;;  %v1426_v21 = vsel %vm1420_vm9, %v1393_v0, %v3436_v45 }
 0x109   : > { %v1327_v7 = vpop.permute.xlu1 %1326  ;;  %v1444_v17 = vsel %vm1420_vm9, %v1411_v37, %v3430_v12  ;;  %v1459_v63 = vsel %vm1453_vm10, %v1426_v21, %v3453_v5  ;;  %v2309_v12 = vcombine.low %v899_v29, %v909_v32  ;;  %v2256_v5 = vrot.slane %v3475_v30, 9  ;;  %v3868_v21 = vld [vmem:[#allocation5_spill] sm:$0xff] }
 0x10a   : > { %1215 = vrot.lane.b32.xlu0 %v2657_v41, %s2546_s24  ;;  %v1607_v38 = vsel %vm1585_vm14, %v1574_v56, %v1327_v7  ;;  %v1477_v59 = vsel %vm1453_vm10, %v1444_v17, %v3447_v52  ;;  %v1492_v45 = vsel %vm1486_vm11, %v1459_v63, %v3472_v14  ;;  %v917_v14 = vrot.slane %v915_v28, 4 }
 0x10b   : > { %1266 = vrot.lane.b32.xlu1 %v2308_v22, %s2547_s25  ;;  %2444 = vmatprep.mubr.msk.bf16.mxu1 %vm1638_vm15, %v1607_v38  ;;  %v1510_v51 = vsel %vm1486_vm11, %v1477_v59, %v3464_v26  ;;  %v1525_v61 = vsel %vm1519_vm12, %v1492_v45, %v1241_v49  ;;  %v3865_v49 = vld [vmem:[#allocation4_spill] sm:$0xff] }
 0x10c   : > { %v1278_v8 = vpop.permute.xlu0 %1277  ;;  %v1543_v25 = vsel %vm1519_vm12, %v1510_v51, %v1259_v11  ;;  %v1558_v52 = vsel %vm1552_vm13, %v1525_v61, %v1276_v33 }
 0x10d   : > { %v3553_v46 = vpop.permute.xlu1 %1040 }
 0x10e   : > { %1248 = vrot.lane.b32.xlu0 %v3202_v40, %s2547_s25  ;;  %v1576_v40 = vsel %vm1552_vm13, %v1543_v25, %v1294_v19  ;;  %v3866_v19 = vld [vmem:[#allocation3_spill] sm:$0xff]  ;;  %v3869_v25 = vld [vmem:[#allocation6_spill] sm:$0xff] }
 0x10f   : > { %1299 = vrot.lane.b32.xlu1 %v3470_v47, %s2548_s28  ;;  %v1350_v47 = vsel %vm1338_vm7, %v3865_v49, %v3404_v15  ;;  %v916_v15 = vsel %vm2626_vm4, %v2256_v5, %v915_v28 }
 0x110   : > { %v1311_v55 = vpop.permute.xlu0 %1310  ;;  %v1395_v11 = vsel %vm1387_vm8, %v1350_v47, %v3428_v48 }
 0x111   : > { %v1591_v26 = vsel %vm1585_vm14, %v1558_v52, %v1311_v55  ;;  %v1329_v34 = vpop.permute.xlu1 %1328  ;;  %v1428_v60 = vsel %vm1420_vm9, %v1395_v11, %v3445_v10  ;;  %v3870_v55 = vld [vmem:[#allocation7_spill] sm:$0xff] }
 0x112   : > { %1250 = vrot.lane.b32.xlu0 %v2606_v4, %s2547_s25  ;;  %2428 = vmatprep.mubr.msk.bf16.mxu0 %vm1638_vm15, %v1591_v26  ;;  %v1609_v30 = vsel %vm1585_vm14, %v1576_v40, %v1329_v34  ;;  %v919_v4 = vsel %vm2626_vm4, %v917_v14, %v918_v54  ;;  %v1461_v31 = vsel %vm1453_vm10, %v1428_v60, %v3458_v39 }
 0x113   : > { %1301 = vrot.lane.b32.xlu1 %v2309_v12, %s2548_s28  ;;  %2445 = vmatmul.mubr.msk.bf16.gmra.mrb[4].mxu1 %vm1638_vm15, %v1609_v30  ;;  %v1494_v48 = vsel %vm1486_vm11, %v1461_v31, %v3486_v18  ;;  %v2310_v23 = vcombine.low %v916_v15, %v919_v4 }
 0x114   : > { %v1025_v58 = vpop.permute.xlu0 %1024  ;;  %v1527_v10 = vsel %vm1519_vm12, %v1494_v48, %v3512_v6 }
 0x115   : > { %v1043_v35 = vpop.permute.xlu1 %1042  ;;  %v1560_v16 = vsel %vm1552_vm13, %v1527_v10, %v1278_v8  ;;  %v1377_v8 = vsel %vm1338_vm7, %v3868_v21, %v3553_v46  ;;  %v1353_v52 = vsel %vm1338_vm7, %v3869_v25, %v1025_v58 }
 0x116   : > { %1283 = vrot.lane.b32.xlu0 %v2759_v1, %s2548_s28  ;;  %v1380_v14 = vsel %vm1338_vm7, %v3870_v55, %v1043_v35 }
 0x117   : > { %1334 = vrot.lane.b32.xlu1 %v3498_v27, %s2549_s4 }
 0x118   : > { %v1313_v62 = vpop.permute.xlu0 %1312 }
 0x119   : > { %v1593_v50 = vsel %vm1585_vm14, %v1560_v16, %v1313_v62  ;;  %v1121_v39 = vpop.permute.xlu1 %1120  ;;  %v3871_v16 = vld [vmem:[#allocation8_spill] sm:$0xff] }
 0x11a   : > { %1285 = vrot.lane.b32.xlu0 %v3866_v19, %s2548_s28  ;;  %2429 = vmatmul.mubr.msk.bf16.gmra.mrb[4].mxu0 %vm1638_vm15, %v1593_v50  ;;  %v1413_v32 = vsel %vm1387_vm8, %v1377_v8, %v1121_v39 }
 0x11b   : > { %1336 = vrot.lane.b32.xlu1 %v2310_v23, %s2549_s4 }
 0x11c   : > { %v1027_v1 = vpop.permute.xlu0 %1026 }
 0x11d   : > { %v1123_v18 = vpop.permute.xlu1 %1122  ;;  %v1356_v62 = vsel %vm1338_vm7, %v3871_v16, %v1027_v1 }
 0x11e   : > { %1318 = vrot.lane.b32.xlu0 %v2657_v41, %s2549_s4  ;;  %v1415_v40 = vsel %vm1387_vm8, %v1380_v14, %v1123_v18 }
 0x120   : > { %v1105_v27 = vpop.permute.xlu0 %1104 }
 0x121   : > { %v1156_v6 = vpop.permute.xlu1 %1155  ;;  %v1397_v54 = vsel %vm1387_vm8, %v1353_v52, %v1105_v27 }
 0x122   : > { %1320 = vrot.lane.b32.xlu0 %v3867_v36, %s2549_s4  ;;  %v1446_v17 = vsel %vm1420_vm9, %v1413_v32, %v1156_v6 }
 0x124   : > { %v1107_v9 = vpop.permute.xlu0 %1106 }
 0x125   : > { %v1158_v22 = vpop.permute.xlu1 %1157  ;;  %v1399_v39 = vsel %vm1387_vm8, %v1356_v62, %v1107_v9 }
 0x126   : > { %v1448_v49 = vsel %vm1420_vm9, %v1415_v40, %v1158_v22 }
 0x128   : > { %v1140_v53 = vpop.permute.xlu0 %1139 }
 0x129   : > { %v1191_v24 = vpop.permute.xlu1 %1190  ;;  %v1430_v26 = vsel %vm1420_vm9, %v1397_v54, %v1140_v53 }
 0x12a   : > { %v1479_v59 = vsel %vm1453_vm10, %v1446_v17, %v1191_v24 }
 0x12c   : > { %v1142_v33 = vpop.permute.xlu0 %1141 }
 0x12d   : > { %v1193_v43 = vpop.permute.xlu1 %1192  ;;  %v1432_v19 = vsel %vm1420_vm9, %v1399_v39, %v1142_v33 }
 0x12e   : > { %v1481_v11 = vsel %vm1453_vm10, %v1448_v49, %v1193_v43 }
 0x130   : > { %v1175_v3 = vpop.permute.xlu0 %1174 }
 0x131   : > { %v1226_v56 = vpop.permute.xlu1 %1225  ;;  %v1463_v47 = vsel %vm1453_vm10, %v1430_v26, %v1175_v3 }
 0x132   : > { %v1512_v45 = vsel %vm1486_vm11, %v1479_v59, %v1226_v56 }
 0x134   : > { %v1177_v7 = vpop.permute.xlu0 %1176 }
 0x135   : > { %v1228_v13 = vpop.permute.xlu1 %1227  ;;  %v1465_v27 = vsel %vm1453_vm10, %v1432_v19, %v1177_v7 }
 0x136   : > { %v1514_v58 = vsel %vm1486_vm11, %v1481_v11, %v1228_v13 }
 0x138   : > { %v1210_v38 = vpop.permute.xlu0 %1209 }
 0x139   : > { %v1261_v44 = vpop.permute.xlu1 %1260  ;;  %v1496_v60 = vsel %vm1486_vm11, %v1463_v47, %v1210_v38 }
 0x13a   : > { %v1545_v51 = vsel %vm1519_vm12, %v1512_v45, %v1261_v44 }
 0x13c   : > { %v1212_v0 = vpop.permute.xlu0 %1211 }
 0x13d   : > { %v1263_v29 = vpop.permute.xlu1 %1262  ;;  %v1498_v36 = vsel %vm1486_vm11, %v1465_v27, %v1212_v0 }
 0x13e   : > { %v1547_v4 = vsel %vm1519_vm12, %v1514_v58, %v1263_v29 }
 0x140   : > { %v1245_v41 = vpop.permute.xlu0 %1244 }
 0x141   : > { %v1296_v37 = vpop.permute.xlu1 %1295  ;;  %v1529_v15 = vsel %vm1519_vm12, %v1496_v60, %v1245_v41 }
 0x142   : > { %v1578_v12 = vsel %vm1552_vm13, %v1545_v51, %v1296_v37 }
 0x144   : > { %v1247_v28 = vpop.permute.xlu0 %1246 }
 0x145   : > { %v1298_v63 = vpop.permute.xlu1 %1297  ;;  %v1531_v22 = vsel %vm1519_vm12, %v1498_v36, %v1247_v28 }
 0x146   : > { %v1580_v48 = vsel %vm1552_vm13, %v1547_v4, %v1298_v63 }
 0x148   : > { %v1280_v61 = vpop.permute.xlu0 %1279 }
 0x149   : > { %v1331_v5 = vpop.permute.xlu1 %1330  ;;  %v1562_v31 = vsel %vm1552_vm13, %v1529_v15, %v1280_v61 }
 0x14a   : > { %v1611_v46 = vsel %vm1585_vm14, %v1578_v12, %v1331_v5 }
 0x14b   : > { %2448 = vmatprep.mubr.msk.bf16.mxu1 %vm1638_vm15, %v1611_v46 }
 0x14c   : > { %v1282_v34 = vpop.permute.xlu0 %1281 }
 0x14d   : > { %v1045_v30 = vpop.permute.xlu1 %1044  ;;  %v1564_v1 = vsel %vm1552_vm13, %v1531_v22, %v1282_v34 }
 0x14e   : > { %v1383_v51 = vsel %vm1338_vm7, %v3154_v42, %v1045_v30 }
 0x150   : > { %v1315_v35 = vpop.permute.xlu0 %1314 }
 0x151   : > { %v1595_v10 = vsel %vm1585_vm14, %v1562_v31, %v1315_v35  ;;  %v1333_v23 = vpop.permute.xlu1 %1332 }
 0x152   : > { %2432 = vmatprep.mubr.msk.bf16.mxu0 %vm1638_vm15, %v1595_v10  ;;  %v1613_v50 = vsel %vm1585_vm14, %v1580_v48, %v1333_v23 }
 0x153   : > { %2449 = vmatmul.mubr.msk.bf16.gmra.mrb[8].mxu1 %vm1638_vm15, %v1613_v50 }
 0x154   : > { %v1029_v18 = vpop.permute.xlu0 %1028 }
 0x155   : > { %v1047_v6 = vpop.permute.xlu1 %1046  ;;  %v1359_v49 = vsel %vm1338_vm7, %v3183_v20, %v1029_v18 }
 0x156   : > { %v1386_v46 = vsel %vm1338_vm7, %v3277_v57, %v1047_v6 }
 0x158   : > { %v1317_v53 = vpop.permute.xlu0 %1316 }
 0x159   : > { %v1597_v24 = vsel %vm1585_vm14, %v1564_v1, %v1317_v53  ;;  %v1125_v43 = vpop.permute.xlu1 %1124  ;;  %v3693_v1 = vld [vmem:[%s3845_s2] ss:$0 sm:$0xff]  ;;  %v3698_v53 = vld [vmem:[%s3845_s2 + $0x1] ss:$0 sm:$0xff] }
 0x15a   : > { %2433 = vmatmul.mubr.msk.bf16.gmra.mrb[8].mxu0 %vm1638_vm15, %v1597_v24  ;;  %v1417_v61 = vsel %vm1387_vm8, %v1383_v51, %v1125_v43 }
 0x15c   : > { %v1031_v9 = vpop.permute.xlu0 %1030 }
 0x15d   : > { %v1127_v3 = vpop.permute.xlu1 %1126  ;;  %v1362_v35 = vsel %vm1338_vm7, %v3325_v2, %v1031_v9 }
 0x15e   : > { %v1419_v14 = vsel %vm1387_vm8, %v1386_v46, %v1127_v3 }
 0x160   : > { %v1109_v56 = vpop.permute.xlu0 %1108 }
 0x161   : > { %v1160_v33 = vpop.permute.xlu1 %1159  ;;  %v1401_v57 = vsel %vm1387_vm8, %v1359_v49, %v1109_v56 }
 0x162   : > { %v1450_v5 = vsel %vm1420_vm9, %v1417_v61, %v1160_v33 }
 0x164   : > { %v1111_v13 = vpop.permute.xlu0 %1110 }
 0x165   : > { %v1162_v38 = vpop.permute.xlu1 %1161  ;;  %v1403_v23 = vsel %vm1387_vm8, %v1362_v35, %v1111_v13 }
 0x166   : > { %v1452_v42 = vsel %vm1420_vm9, %v1419_v14, %v1162_v38 }
 0x168   : > { %v1144_v7 = vpop.permute.xlu0 %1143 }
 0x169   : > { %v1195_v44 = vpop.permute.xlu1 %1194  ;;  %v1434_v60 = vsel %vm1420_vm9, %v1401_v57, %v1144_v7 }
 0x16a   : > { %v1483_v52 = vsel %vm1453_vm10, %v1450_v5, %v1195_v44 }
 0x16c   : > { %v1146_v29 = vpop.permute.xlu0 %1145 }
 0x16d   : > { %v1197_v0 = vpop.permute.xlu1 %1196  ;;  %v1436_v62 = vsel %vm1420_vm9, %v1403_v23, %v1146_v29 }
 0x16e   : > { %v1485_v47 = vsel %vm1453_vm10, %v1452_v42, %v1197_v0 }
 0x170   : > { %v1179_v41 = vpop.permute.xlu0 %1178 }
 0x171   : > { %v1230_v37 = vpop.permute.xlu1 %1229  ;;  %v1467_v4 = vsel %vm1453_vm10, %v1434_v60, %v1179_v41 }
 0x172   : > { %v1516_v55 = vsel %vm1486_vm11, %v1483_v52, %v1230_v37 }
 0x174   : > { %v1181_v21 = vpop.permute.xlu0 %1180 }
 0x175   : > { %v1232_v8 = vpop.permute.xlu1 %1231  ;;  %v1469_v19 = vsel %vm1453_vm10, %v1436_v62, %v1181_v21 }
 0x176   : > { %v1518_v11 = vsel %vm1486_vm11, %v1485_v47, %v1232_v8 }
 0x178   : > { %v1214_v32 = vpop.permute.xlu0 %1213 }
 0x179   : > { %v1265_v28 = vpop.permute.xlu1 %1264  ;;  %v1500_v48 = vsel %vm1486_vm11, %v1467_v4, %v1214_v32 }
 0x17a   : > { %v1549_v54 = vsel %vm1519_vm12, %v1516_v55, %v1265_v28 }
 0x17c   : > { %v1216_v17 = vpop.permute.xlu0 %1215 }
 0x17d   : > { %v1267_v63 = vpop.permute.xlu1 %1266  ;;  %v1502_v18 = vsel %vm1486_vm11, %v1469_v19, %v1216_v17 }
 0x17e   : > { %v1551_v58 = vsel %vm1519_vm12, %v1518_v11, %v1267_v63 }
 0x180   : > { %v1249_v59 = vpop.permute.xlu0 %1248 }
 0x181   : > { %v1300_v45 = vpop.permute.xlu1 %1299  ;;  %v1533_v16 = vsel %vm1519_vm12, %v1500_v48, %v1249_v59 }
 0x182   : > { %v1582_v26 = vsel %vm1552_vm13, %v1549_v54, %v1300_v45 }
 0x184   : > { %v1251_v12 = vpop.permute.xlu0 %1250 }
 0x185   : > { %v1302_v25 = vpop.permute.xlu1 %1301  ;;  %v1535_v27 = vsel %vm1519_vm12, %v1502_v18, %v1251_v12 }
 0x186   : > { %v1584_v31 = vsel %vm1552_vm13, %v1551_v58, %v1302_v25 }
 0x188   : > { %v1284_v40 = vpop.permute.xlu0 %1283 }
 0x189   : > { %v1335_v34 = vpop.permute.xlu1 %1334  ;;  %v1566_v50 = vsel %vm1552_vm13, %v1533_v16, %v1284_v40 }
 0x18a   : > { %v1615_v30 = vsel %vm1585_vm14, %v1582_v26, %v1335_v34 }
 0x18b   : > { %2452 = vmatprep.mubr.msk.bf16.mxu1 %vm1638_vm15, %v1615_v30 }
 0x18c   : > { %v1286_v15 = vpop.permute.xlu0 %1285 }
 0x18d   : > { %v1337_v20 = vpop.permute.xlu1 %1336  ;;  %v1568_v6 = vsel %vm1552_vm13, %v1535_v27, %v1286_v15 }
 0x18e   : > { %v1617_v10 = vsel %vm1585_vm14, %v1584_v31, %v1337_v20 }
 0x18f   : > { %2453 = vmatmul.mubr.msk.bf16.gmra.mrb[12].mxu1 %vm1638_vm15, %v1617_v10 }
 0x190   : > { %v1319_v39 = vpop.permute.xlu0 %1318 }
 0x191   : > { %v1599_v2 = vsel %vm1585_vm14, %v1566_v50, %v1319_v39 }
 0x192   : > { %2436 = vmatprep.mubr.msk.bf16.mxu0 %vm1638_vm15, %v1599_v2 }
 0x194   : > { %v1321_v36 = vpop.permute.xlu0 %1320 }
 0x195   : > { %v1601_v22 = vsel %vm1585_vm14, %v1568_v6, %v1321_v36 }
 0x196   : > { %2437 = vmatmul.mubr.msk.bf16.gmra.mrb[12].mxu0 %vm1638_vm15, %v1601_v22 }
 0x1a6   : > { %v2442_v24 = vpop.f32.mrb[0].mxu1 }
 0x1a7   : > { %v1860_v43 = vmul.f32 %v2442_v24, %v3693_v1  ;;  %v1773_v9 = vpop.f32.mrb[1].mxu1 }
 0x1a8   : > { %v1858_v3 = vmul.f32 %v3693_v1, %v1773_v9  ;;  %v2443_v56 = vpop.f32.mrb[2].mxu1 }
 0x1a9   : > { %v1896_v33 = vadd.f32 %v3698_v53, %v1860_v43  ;;  %v1861_v13 = vmul.f32 %v2443_v56, %v3693_v1  ;;  %v1776_v38 = vpop.f32.mrb[3].mxu1 }
 0x1aa   : > { %v1894_v7 = vadd.f32 %v3698_v53, %v1858_v3  ;;  %v1859_v44 = vmul.f32 %v3693_v1, %v1776_v38 }
 0x1ab   : > { %v1928_v29 = vmax.f32 %v1896_v33, 0.0  ;;  %v1897_v0 = vadd.f32 %v3698_v53, %v1861_v13 }
 0x1ac   : > { %v1926_v41 = vmax.f32 %v1894_v7, 0.0  ;;  %v1895_v37 = vadd.f32 %v3698_v53, %v1859_v44 }
 0x1ad   : > { %v2426_v21 = vpop.f32.mrb[0].mxu0  ;;  %v2385_v8 = vpack.c.bf16 %v1928_v29, %v1928_v29  ;;  %v1929_v32 = vmax.f32 %v1897_v0, 0.0 }
 0x1ae   : > { %v1844_v28 = vmul.f32 %v2426_v21, %v3693_v1  ;;  %v1709_v17 = vpop.f32.mrb[1].mxu0  ;;  %v2383_v63 = vpack.c.bf16 %v1926_v41, %v1926_v41  ;;  %v1927_v59 = vmax.f32 %v1895_v37, 0.0 }
 0x1af   : > { %2089 = vst.msk [vmem:[%s3711_s18 + $0x48] sm:$0xf] %vm2070_vm0, %v2385_v8  ;;  %v1842_v45 = vmul.f32 %v3693_v1, %v1709_v17  ;;  %v2427_v51 = vpop.f32.mrb[2].mxu0  ;;  %v2386_v61 = vpack.c.bf16 %v1929_v32, %v1929_v32 }
 0x1b0   : > { %v1880_v12 = vadd.f32 %v3698_v53, %v1844_v28  ;;  %2087 = vst.msk [vmem:[%s3711_s18 + $0x40] sm:$0xf] %vm2070_vm0, %v2383_v63  ;;  %v1845_v5 = vmul.f32 %v2427_v51, %v3693_v1  ;;  %v1712_v25 = vpop.f32.mrb[3].mxu0  ;;  %v2384_v52 = vpack.c.bf16 %v1927_v59, %v1927_v59 }
 0x1b1   : > { %v1878_v46 = vadd.f32 %v3698_v53, %v1842_v45  ;;  %2090 = vst.msk [vmem:[%s3711_s18 + $0x4c] sm:$0xf] %vm2070_vm0, %v2386_v61  ;;  %v1843_v55 = vmul.f32 %v3693_v1, %v1712_v25 }
 0x1b2   : > { %v1912_v14 = vmax.f32 %v1880_v12, 0.0  ;;  %v1881_v54 = vadd.f32 %v3698_v53, %v1845_v5  ;;  %2088 = vst.msk [vmem:[%s3711_s18 + $0x44] sm:$0xf] %vm2070_vm0, %v2384_v52 }
 0x1b3   : > { %v1910_v40 = vmax.f32 %v1878_v46, 0.0  ;;  %v1879_v42 = vadd.f32 %v3698_v53, %v1843_v55 }
 0x1b4   : > { %v2369_v26 = vpack.c.bf16 %v1912_v14, %v1912_v14  ;;  %v1913_v34 = vmax.f32 %v1881_v54, 0.0 }
 0x1b5   : > { %v2367_v49 = vpack.c.bf16 %v1910_v40, %v1910_v40  ;;  %v1911_v47 = vmax.f32 %v1879_v42, 0.0 }
 0x1b6   : > { %2073 = vst.msk [vmem:[%s3711_s18 + $0x8] sm:$0xf] %vm2070_vm0, %v2369_v26  ;;  %v2370_v30 = vpack.c.bf16 %v1913_v34, %v1913_v34 }
 0x1b7   : > { %2071 = vst.msk [vmem:[%s3711_s18] sm:$0xf] %vm2070_vm0, %v2367_v49  ;;  %v2368_v57 = vpack.c.bf16 %v1911_v47, %v1911_v47 }
 0x1b8   : > { %2074 = vst.msk [vmem:[%s3711_s18 + $0xc] sm:$0xf] %vm2070_vm0, %v2370_v30 }
 0x1b9   : > { %2072 = vst.msk [vmem:[%s3711_s18 + $0x4] sm:$0xf] %vm2070_vm0, %v2368_v57 }
 0x1e6   : > { %v2446_v11 = vpop.f32.mrb[4].mxu1 }
 0x1e7   : > { %v1864_v60 = vmul.f32 %v2446_v11, %v3693_v1  ;;  %v1789_v58 = vpop.f32.mrb[5].mxu1 }
 0x1e8   : > { %v1862_v15 = vmul.f32 %v3693_v1, %v1789_v58  ;;  %v2447_v4 = vpop.f32.mrb[6].mxu1 }
 0x1e9   : > { %v1900_v31 = vadd.f32 %v3698_v53, %v1864_v60  ;;  %v1865_v20 = vmul.f32 %v2447_v4, %v3693_v1  ;;  %v1792_v35 = vpop.f32.mrb[7].mxu1 }
 0x1ea   : > { %v1898_v48 = vadd.f32 %v3698_v53, %v1862_v15  ;;  %v1863_v10 = vmul.f32 %v3693_v1, %v1792_v35 }
 0x1eb   : > { %v1932_v23 = vmax.f32 %v1900_v31, 0.0  ;;  %v1901_v16 = vadd.f32 %v3698_v53, %v1865_v20 }
 0x1ec   : > { %v1930_v62 = vmax.f32 %v1898_v48, 0.0  ;;  %v1899_v50 = vadd.f32 %v3698_v53, %v1863_v10 }
 0x1ed   : > { %v2430_v39 = vpop.f32.mrb[4].mxu0  ;;  %v2389_v19 = vpack.c.bf16 %v1932_v23, %v1932_v23  ;;  %v1933_v2 = vmax.f32 %v1901_v16, 0.0 }
 0x1ee   : > { %v1848_v18 = vmul.f32 %v2430_v39, %v3693_v1  ;;  %v1725_v27 = vpop.f32.mrb[5].mxu0  ;;  %v2387_v6 = vpack.c.bf16 %v1930_v62, %v1930_v62  ;;  %v1931_v36 = vmax.f32 %v1899_v50, 0.0 }
 0x1ef   : > { %2093 = vst.msk [vmem:[%s3711_s18 + $0x58] sm:$0xf] %vm2070_vm0, %v2389_v19  ;;  %v1846_v22 = vmul.f32 %v3693_v1, %v1725_v27  ;;  %v2431_v24 = vpop.f32.mrb[6].mxu0  ;;  %v2390_v43 = vpack.c.bf16 %v1933_v2, %v1933_v2 }
 0x1f0   : > { %v1884_v9 = vadd.f32 %v3698_v53, %v1848_v18  ;;  %2091 = vst.msk [vmem:[%s3711_s18 + $0x50] sm:$0xf] %vm2070_vm0, %v2387_v6  ;;  %v1849_v3 = vmul.f32 %v2431_v24, %v3693_v1  ;;  %v1728_v56 = vpop.f32.mrb[7].mxu0  ;;  %v2388_v33 = vpack.c.bf16 %v1931_v36, %v1931_v36 }
 0x1f1   : > { %v1882_v13 = vadd.f32 %v3698_v53, %v1846_v22  ;;  %2094 = vst.msk [vmem:[%s3711_s18 + $0x5c] sm:$0xf] %vm2070_vm0, %v2390_v43  ;;  %v1847_v38 = vmul.f32 %v3693_v1, %v1728_v56 }
 0x1f2   : > { %v1916_v7 = vmax.f32 %v1884_v9, 0.0  ;;  %v1885_v44 = vadd.f32 %v3698_v53, %v1849_v3  ;;  %2092 = vst.msk [vmem:[%s3711_s18 + $0x54] sm:$0xf] %vm2070_vm0, %v2388_v33 }
 0x1f3   : > { %v1914_v29 = vmax.f32 %v1882_v13, 0.0  ;;  %v1883_v0 = vadd.f32 %v3698_v53, %v1847_v38 }
 0x1f4   : > { %v2373_v41 = vpack.c.bf16 %v1916_v7, %v1916_v7  ;;  %v1917_v37 = vmax.f32 %v1885_v44, 0.0 }
 0x1f5   : > { %v2371_v21 = vpack.c.bf16 %v1914_v29, %v1914_v29  ;;  %v1915_v8 = vmax.f32 %v1883_v0, 0.0 }
 0x1f6   : > { %2077 = vst.msk [vmem:[%s3711_s18 + $0x18] sm:$0xf] %vm2070_vm0, %v2373_v41  ;;  %v2374_v32 = vpack.c.bf16 %v1917_v37, %v1917_v37 }
 0x1f7   : > { %2075 = vst.msk [vmem:[%s3711_s18 + $0x10] sm:$0xf] %vm2070_vm0, %v2371_v21  ;;  %v2372_v28 = vpack.c.bf16 %v1915_v8, %v1915_v8 }
 0x1f8   : > { %2078 = vst.msk [vmem:[%s3711_s18 + $0x1c] sm:$0xf] %vm2070_vm0, %v2374_v32 }
 0x1f9   : > { %2076 = vst.msk [vmem:[%s3711_s18 + $0x14] sm:$0xf] %vm2070_vm0, %v2372_v28 }
 0x226   : > { %v2450_v17 = vpop.f32.mrb[8].mxu1 }
 0x227   : > { %v1868_v63 = vmul.f32 %v2450_v17, %v3693_v1  ;;  %v1805_v59 = vpop.f32.mrb[9].mxu1 }
 0x228   : > { %v1866_v45 = vmul.f32 %v3693_v1, %v1805_v59  ;;  %v2451_v51 = vpop.f32.mrb[10].mxu1 }
 0x229   : > { %v1904_v61 = vadd.f32 %v3698_v53, %v1868_v63  ;;  %v1869_v12 = vmul.f32 %v2451_v51, %v3693_v1  ;;  %v1808_v5 = vpop.f32.mrb[11].mxu1 }
 0x22a   : > { %v1902_v25 = vadd.f32 %v3698_v53, %v1866_v45  ;;  %v1867_v52 = vmul.f32 %v3693_v1, %v1808_v5 }
 0x22b   : > { %v1936_v46 = vmax.f32 %v1904_v61, 0.0  ;;  %v1905_v55 = vadd.f32 %v3698_v53, %v1869_v12 }
 0x22c   : > { %v1934_v14 = vmax.f32 %v1902_v25, 0.0  ;;  %v1903_v54 = vadd.f32 %v3698_v53, %v1867_v52 }
 0x22d   : > { %v2434_v40 = vpop.f32.mrb[8].mxu0  ;;  %v2393_v42 = vpack.c.bf16 %v1936_v46, %v1936_v46  ;;  %v1937_v26 = vmax.f32 %v1905_v55, 0.0 }
 0x22e   : > { %v1852_v34 = vmul.f32 %v2434_v40, %v3693_v1  ;;  %v1741_v49 = vpop.f32.mrb[9].mxu0  ;;  %v2391_v47 = vpack.c.bf16 %v1934_v14, %v1934_v14  ;;  %v1935_v30 = vmax.f32 %v1903_v54, 0.0 }
 0x22f   : > { %2097 = vst.msk [vmem:[%s3711_s18 + $0x68] sm:$0xf] %vm2070_vm0, %v2393_v42  ;;  %v1850_v57 = vmul.f32 %v3693_v1, %v1741_v49  ;;  %v2435_v11 = vpop.f32.mrb[10].mxu0  ;;  %v2394_v60 = vpack.c.bf16 %v1937_v26, %v1937_v26 }
 0x230   : > { %v1888_v58 = vadd.f32 %v3698_v53, %v1852_v34  ;;  %2095 = vst.msk [vmem:[%s3711_s18 + $0x60] sm:$0xf] %vm2070_vm0, %v2391_v47  ;;  %v1853_v15 = vmul.f32 %v2435_v11, %v3693_v1  ;;  %v1744_v4 = vpop.f32.mrb[11].mxu0  ;;  %v2392_v31 = vpack.c.bf16 %v1935_v30, %v1935_v30 }
 0x231   : > { %v1886_v20 = vadd.f32 %v3698_v53, %v1850_v57  ;;  %2098 = vst.msk [vmem:[%s3711_s18 + $0x6c] sm:$0xf] %vm2070_vm0, %v2394_v60  ;;  %v1851_v35 = vmul.f32 %v3693_v1, %v1744_v4 }
 0x232   : > { %v1920_v48 = vmax.f32 %v1888_v58, 0.0  ;;  %v1889_v10 = vadd.f32 %v3698_v53, %v1853_v15  ;;  %2096 = vst.msk [vmem:[%s3711_s18 + $0x64] sm:$0xf] %vm2070_vm0, %v2392_v31 }
 0x233   : > { %v1918_v23 = vmax.f32 %v1886_v20, 0.0  ;;  %v1887_v16 = vadd.f32 %v3698_v53, %v1851_v35 }
 0x234   : > { %v2377_v62 = vpack.c.bf16 %v1920_v48, %v1920_v48  ;;  %v1921_v50 = vmax.f32 %v1889_v10, 0.0 }
 0x235   : > { %v2375_v39 = vpack.c.bf16 %v1918_v23, %v1918_v23  ;;  %v1919_v19 = vmax.f32 %v1887_v16, 0.0 }
 0x236   : > { %2081 = vst.msk [vmem:[%s3711_s18 + $0x28] sm:$0xf] %vm2070_vm0, %v2377_v62  ;;  %v2378_v2 = vpack.c.bf16 %v1921_v50, %v1921_v50 }
 0x237   : > { %2079 = vst.msk [vmem:[%s3711_s18 + $0x20] sm:$0xf] %vm2070_vm0, %v2375_v39  ;;  %v2376_v18 = vpack.c.bf16 %v1919_v19, %v1919_v19 }
 0x238   : > { %2082 = vst.msk [vmem:[%s3711_s18 + $0x2c] sm:$0xf] %vm2070_vm0, %v2378_v2 }
 0x239   : > { %2080 = vst.msk [vmem:[%s3711_s18 + $0x24] sm:$0xf] %vm2070_vm0, %v2376_v18 }
 0x262   : > { %v2454_v27 = vpop.f32.mrb[12].mxu1 }
 0x263   : > { %v1872_v6 = vmul.f32 %v2454_v27, %v3693_v1  ;;  %v1821_v36 = vpop.f32.mrb[13].mxu1 }
 0x264   : > { %v1870_v22 = vmul.f32 %v3693_v1, %v1821_v36  ;;  %v2455_v24 = vpop.f32.mrb[14].mxu1 }
 0x265   : > { %v1908_v43 = vadd.f32 %v3698_v53, %v1872_v6  ;;  %v1873_v9 = vmul.f32 %v2455_v24, %v3693_v1  ;;  %v1824_v3 = vpop.f32.mrb[15].mxu1 }
 0x266   : > { %v1906_v56 = vadd.f32 %v3698_v53, %v1870_v22  ;;  %v1871_v33 = vmul.f32 %v3693_v1, %v1824_v3 }
 0x267   : > { %v1940_v13 = vmax.f32 %v1908_v43, 0.0  ;;  %v1909_v38 = vadd.f32 %v3698_v53, %v1873_v9 }
 0x268   : > { %v1938_v7 = vmax.f32 %v1906_v56, 0.0  ;;  %v1907_v44 = vadd.f32 %v3698_v53, %v1871_v33 }
 0x269   : > { %v2438_v29 = vpop.f32.mrb[12].mxu0  ;;  %v2397_v0 = vpack.c.bf16 %v1940_v13, %v1940_v13  ;;  %v1941_v41 = vmax.f32 %v1909_v38, 0.0 }
 0x26a   : > { %v1856_v37 = vmul.f32 %v2438_v29, %v3693_v1  ;;  %v1757_v21 = vpop.f32.mrb[13].mxu0  ;;  %v2395_v8 = vpack.c.bf16 %v1938_v7, %v1938_v7  ;;  %v1939_v32 = vmax.f32 %v1907_v44, 0.0 }
 0x26b   : > { %2101 = vst.msk [vmem:[%s3711_s18 + $0x78] sm:$0xf] %vm2070_vm0, %v2397_v0  ;;  %v1854_v28 = vmul.f32 %v3693_v1, %v1757_v21  ;;  %v2439_v17 = vpop.f32.mrb[14].mxu0  ;;  %v2398_v63 = vpack.c.bf16 %v1941_v41, %v1941_v41 }
 0x26c   : > { %v1892_v59 = vadd.f32 %v3698_v53, %v1856_v37  ;;  %2099 = vst.msk [vmem:[%s3711_s18 + $0x70] sm:$0xf] %vm2070_vm0, %v2395_v8  ;;  %v1857_v45 = vmul.f32 %v2439_v17, %v3693_v1  ;;  %v1760_v51 = vpop.f32.mrb[15].mxu0  ;;  %v2396_v61 = vpack.c.bf16 %v1939_v32, %v1939_v32 }
 0x26d   : > { %v1890_v12 = vadd.f32 %v3698_v53, %v1854_v28  ;;  %2102 = vst.msk [vmem:[%s3711_s18 + $0x7c] sm:$0xf] %vm2070_vm0, %v2398_v63  ;;  %v1855_v5 = vmul.f32 %v3693_v1, %v1760_v51 }
 0x26e   : > { %v1924_v25 = vmax.f32 %v1892_v59, 0.0  ;;  %v1893_v52 = vadd.f32 %v3698_v53, %v1857_v45  ;;  %2100 = vst.msk [vmem:[%s3711_s18 + $0x74] sm:$0xf] %vm2070_vm0, %v2396_v61 }
 0x26f   : > { %v1922_v46 = vmax.f32 %v1890_v12, 0.0  ;;  %v1891_v55 = vadd.f32 %v3698_v53, %v1855_v5 }
 0x270   : > { %v2381_v14 = vpack.c.bf16 %v1924_v25, %v1924_v25  ;;  %v1925_v54 = vmax.f32 %v1893_v52, 0.0 }
 0x271   : > { %v2379_v40 = vpack.c.bf16 %v1922_v46, %v1922_v46  ;;  %v1923_v42 = vmax.f32 %v1891_v55, 0.0 }
 0x272   : > { %2085 = vst.msk [vmem:[%s3711_s18 + $0x38] sm:$0xf] %vm2070_vm0, %v2381_v14  ;;  %v2382_v26 = vpack.c.bf16 %v1925_v54, %v1925_v54 }
 0x273   : > { %2083 = vst.msk [vmem:[%s3711_s18 + $0x30] sm:$0xf] %vm2070_vm0, %v2379_v40  ;;  %v2380_v34 = vpack.c.bf16 %v1923_v42, %v1923_v42 }
 0x274   : > { %2086 = vst.msk [vmem:[%s3711_s18 + $0x3c] sm:$0xf] %vm2070_vm0, %v2382_v26 }
 0x275   : > { %2084 = vst.msk [vmem:[%s3711_s18 + $0x34] sm:$0xf] %vm2070_vm0, %v2380_v34 }
 0x276 PF: > { %s13_s14 = sadd.s32 1, %s2540_s14   ;;  %s3872_s12 = smov %s2536_s13 }
 0x277   : > { %p10_p5 = scmp.ge.s32.totalorder %s13_s14, 4   ;;  %s3873_s13 = smov %s3875_s15 }
 0x279   :  { %12 = sbr.rel (!%p10_p5) target bundleno = 2 (0x2), region = 69 }

</bundles_post_ra>
